<compile_context>
chip_gen: v7x
topology: tpu7x:2x2x1
jax: 0.10.0
libtpu: 0.0.40
codegen_flags: <defaults>
</compile_context>

<pallas_src>
import numpy as np
import jax
import jax.numpy as jnp
from jax.experimental import pallas as pl
from jax.experimental.pallas import tpu as pltpu

# ---------------- configuration ----------------
B = 2
DIM = 384          # forward() takes the hard-coded `C == 384` branch
TOKEN_DIM = 64
IMG_SIZE = 32
RATIO = 4
KH, KW = 3, 3
SH, SW = 2, 2
PH, PW = 1, 1
H_OUT = IMG_SIZE // RATIO                      # 8
W_OUT = IMG_SIZE // RATIO                      # 8
N_H = (H_OUT + 2 * PH - KH) // SH + 1          # 4
N_W = (W_OUT + 2 * PW - KW) // SW + 1          # 4
L = N_H * N_W                                  # 16 input tokens
P = H_OUT * W_OUT                              # 64 output tokens
KK = KH * KW                                   # 9
EPS = 1e-5


def _gelu_exact(x):
    # nn.GELU default (erf-based, approximate='none')
    return 0.5 * x * (1.0 + jax.lax.erf(x * 0.7071067811865476))


# ---------------- the single fused kernel (one batch element per grid step) -----------
def fused_decoder_kernel(x_ref, enc_ref, g_ref, bta_ref,
                         w1_ref, b1_ref, w2_ref, b2_ref,
                         pw_ref, s_ref, bfold_ref,
                         f1_ref, fb1_ref, f2_ref, fb2_ref,
                         o_ref):
    f32, bf16 = jnp.float32, jnp.bfloat16

    # --- LayerNorm(DIM) in f32 over (L, DIM) rows ---
    x = x_ref[...]                                            # (L, DIM)
    mean = jnp.mean(x, axis=-1, keepdims=True)
    xc = x - mean
    var = jnp.mean(xc * xc, axis=-1, keepdims=True)
    y = xc * jax.lax.rsqrt(var + EPS) * g_ref[...] + bta_ref[...]

    # --- mlp: Linear(DIM,TD) -> GELU -> Linear(TD,TD); bf16 operands, f32 accum ---
    h = jnp.dot(y.astype(bf16), w1_ref[...], preferred_element_type=f32) + b1_ref[...]
    h = _gelu_exact(h)
    h = jnp.dot(h.astype(bf16), w2_ref[...], preferred_element_type=f32) + b2_ref[...]

    # --- project: ONE bf16 matmul; columns are tap-major (col = k*TD + c), no bias ---
    o_all = jnp.dot(h.astype(bf16), pw_ref[...], preferred_element_type=f32)  # (L, KK*TD)

    # stack per-tap slices along rows -> (KK*L, TD)  (static lane slices + sublane concat)
    o_stacked = jnp.concatenate(
        [o_all[:, k * TOKEN_DIM:(k + 1) * TOKEN_DIM] for k in range(KK)], axis=0)

    # --- fold (nn.Fold) as ONE scatter matmul; S is 0/1 (stored bf16, exact after upcast),
    #     accumulation kept in f32 so the fold is an exact sum; per-tap biases were
    #     pre-folded into bfold (per-row in-bounds counts -> matches nn.Fold borders).
    s = s_ref[...].astype(f32)                                # (P, KK*L)
    dec_tok = jnp.dot(s, o_stacked, preferred_element_type=f32) + bfold_ref[...]  # (P, TD)

    # --- concatFuse: single K=2*TD matmul on an in-VMEM concat ---
    xcat = jnp.concatenate([dec_tok, enc_ref[...]], axis=-1).astype(bf16)      # (P, 2*TD)
    h1 = jnp.dot(xcat, f1_ref[...], preferred_element_type=f32) + fb1_ref[...]
    h1 = _gelu_exact(h1)
    o_ref[...] = (jnp.dot(h1.astype(bf16), f2_ref[...], preferred_element_type=f32)
                  + fb2_ref[...])


# ---------------- pallas_call wrapper ----------------
def _const_spec(a):
    # full-array block, same block every grid step -> DMA'd once, stays VMEM-resident
    return pl.BlockSpec(a.shape, lambda i: (0,) * a.ndim)


_COST = pl.CostEstimate(flops=9_700_000, transcendentals=10_240,
                        bytes_accessed=310_000)


@jax.jit
def fuse_mamba_forward(kp, dec_fea, enc_fea):
    Bx, N, C = dec_fea.shape
    assert C == DIM and N == L                    # the `C == 384` branch is taken
    x2d = dec_fea.reshape(Bx * N, C)              # bitcast (no data movement)
    enc2d = enc_fea.reshape(Bx * P, TOKEN_DIM)    # bitcast

    args = (x2d, enc2d, kp["ln_g"], kp["ln_b"],
            kp["mlp_w1"], kp["mlp_b1"], kp["mlp_w2"], kp["mlp_b2"],
            kp["proj_w_all"], kp["fold_S"], kp["bias_fold"],
            kp["fuse_w1"], kp["fuse_b1"], kp["fuse_w2"], kp["fuse_b2"])

    in_specs = [
        pl.BlockSpec((L, DIM), lambda i: (i, 0)),          # dec tokens, one batch elem/step
        pl.BlockSpec((P, TOKEN_DIM), lambda i: (i, 0)),    # enc tokens
    ] + [_const_spec(a) for a in args[2:]]                 # weights / constants: resident

    out = pl.pallas_call(
        fused_decoder_kernel,
        out_shape=jax.ShapeDtypeStruct((Bx * P, TOKEN_DIM), jnp.float32),
        grid=(Bx,),
        in_specs=in_specs,
        out_specs=pl.BlockSpec((P, TOKEN_DIM), lambda i: (i, 0)),
        compiler_params=pltpu.CompilerParams(dimension_semantics=("parallel",)),
        cost_estimate=_COST,
    )(*args)
    return out.reshape(Bx, P, TOKEN_DIM)          # bitcast


# ---------------- fold scatter + pre-folded bias (nn.Fold semantics) -------------------
def build_fold_constants(proj_b):
    """S[p, k*L + l] = 1 iff patch l, tap k lands (in-bounds) on output pixel p.
    bias_fold[p, c] = sum_k count_k[p] * b_tap[k, c]  (border pixels only get biases
    of in-bounds taps, exactly like nn.Fold)."""
    S = np.zeros((P, KK * L), np.float32)
    cnt = np.zeros((KK, P), np.float32)
    for li in range(N_H):
        for lj in range(N_W):
            l = li * N_W + lj
            for ki in range(KH):
                for kj in range(KW):
                    k = ki * KW + kj
                    y = li * SH - PH + ki
                    x = lj * SW - PW + kj
                    if 0 <= y < H_OUT and 0 <= x < W_OUT:
                        p = y * W_OUT + x
                        S[p, k * L + l] = 1.0
                        cnt[k, p] += 1.0
    # PyTorch project column o = c*KK + k  ->  b_tap[k, c]
    b_tap = np.asarray(proj_b).reshape(TOKEN_DIM, KK).T          # (KK, TD)
    bias_fold = cnt.T @ b_tap                                    # (P, TD)
    return (jnp.asarray(S, jnp.bfloat16),                        # 0/1 -> bf16 is exact
            jnp.asarray(bias_fold, jnp.float32))


# ---------------- one-time parameter repack for the kernel ----------------
def prepare_kernel_params(params):
    """Repack canonical (PyTorch-layout) params: bf16 MXU weights, tap-major project
    weight (one matmul), lane-dense fold scatter + pre-folded fold bias. Done once."""
    bf16 = jnp.bfloat16
    # project weight: PyTorch column o = c*KK + k  ->  tap-major column k*TD + c
    proj_w_all = (params["proj_w"].reshape(TOKEN_DIM, TOKEN_DIM, KK)
                  .transpose(0, 2, 1).reshape(TOKEN_DIM, KK * TOKEN_DIM))
    fold_S, bias_fold = build_fold_constants(params["proj_b"])
    return dict(
        ln_g=params["ln_g"], ln_b=params["ln_b"],
        mlp_w1=params["mlp_w1"].astype(bf16), mlp_b1=params["mlp_b1"],
        mlp_w2=params["mlp_w2"].astype(bf16), mlp_b2=params["mlp_b2"],
        proj_w_all=proj_w_all.astype(bf16),
        fold_S=fold_S, bias_fold=bias_fold,
        fuse_w1=params["fuse_w1"].astype(bf16), fuse_b1=params["fuse_b1"],
        fuse_w2=params["fuse_w2"].astype(bf16), fuse_b2=params["fuse_b2"],
    )


# ---------------- pure-JAX reference (same numerical contract: bf16 at the MXU) --------
@jax.jit
def reference_forward(params, dec_fea, enc_fea):
    bf16 = jnp.bfloat16

    def bdot(a, w):
        return jnp.dot(a.astype(bf16), w.astype(bf16), preferred_element_type=jnp.float32)

    x = dec_fea
    mean = jnp.mean(x, -1, keepdims=True)
    xc = x - mean
    var = jnp.mean(xc * xc, -1, keepdims=True)
    y = xc * jax.lax.rsqrt(var + EPS) * params["ln_g"][0] + params["ln_b"][0]
    h = _gelu_exact(bdot(y, params["mlp_w1"]) + params["mlp_b1"][0])
    h = bdot(h, params["mlp_w2"]) + params["mlp_b2"][0]
    p = bdot(h, params["proj_w"]) + params["proj_b"][0]          # (B, L, TD*KK)

    # explicit nn.Fold: sum overlapping patches into a padded image, then crop
    cols = p.reshape(B, L, TOKEN_DIM, KH, KW)
    img = jnp.zeros((B, TOKEN_DIM, H_OUT + 2 * PH, W_OUT + 2 * PW), jnp.float32)
    for li in range(N_H):
        for lj in range(N_W):
            l = li * N_W + lj
            img = img.at[:, :, li * SH:li * SH + KH, lj * SW:lj * SW + KW].add(cols[:, l])
    img = img[:, :, PH:PH + H_OUT, PW:PW + W_OUT]
    dec_tok = img.reshape(B, TOKEN_DIM, P).transpose(0, 2, 1)    # (B, P, TD)

    xcat = jnp.concatenate([dec_tok, enc_fea], -1)
    o = _gelu_exact(bdot(xcat, params["fuse_w1"]) + params["fuse_b1"][0])
    o = bdot(o, params["fuse_w2"]) + params["fuse_b2"][0]
    return o


# ---------------- parameter init (deterministic, synthetic, PyTorch layout) ------------
def init_params(key):
    ks = jax.random.split(key, 12)

    def lin(kw, kb, fan_in, fan_out):
        w = jax.random.normal(kw, (fan_in, fan_out), jnp.float32) / np.sqrt(fan_in)
        b = jax.random.normal(kb, (1, fan_out), jnp.float32) * 0.01
        return w, b

    mlp_w1, mlp_b1 = lin(ks[0], ks[1], DIM, TOKEN_DIM)
    mlp_w2, mlp_b2 = lin(ks[2], ks[3], TOKEN_DIM, TOKEN_DIM)
    proj_w, proj_b = lin(ks[4], ks[5], TOKEN_DIM, TOKEN_DIM * KK)   # column o = c*KK + k
    fuse_w1, fuse_b1 = lin(ks[6], ks[7], 2 * TOKEN_DIM, TOKEN_DIM)
    fuse_w2, fuse_b2 = lin(ks[8], ks[9], TOKEN_DIM, TOKEN_DIM)
    ln_g = 1.0 + 0.1 * jax.random.normal(ks[10], (1, DIM), jnp.float32)
    ln_b = 0.1 * jax.random.normal(ks[11], (1, DIM), jnp.float32)
    return dict(ln_g=ln_g, ln_b=ln_b,
                mlp_w1=mlp_w1, mlp_b1=mlp_b1, mlp_w2=mlp_w2, mlp_b2=mlp_b2,
                proj_w=proj_w, proj_b=proj_b,
                fuse_w1=fuse_w1, fuse_b1=fuse_b1, fuse_w2=fuse_w2, fuse_b2=fuse_b2)


if __name__ == "__main__":
    key = jax.random.PRNGKey(0)
    k1, k2, k3 = jax.random.split(key, 3)
    params = init_params(k1)
    kparams = prepare_kernel_params(params)

    dec_fea = jax.random.normal(k2, (B, L, DIM), jnp.float32)          # (2, 16, 384)
    enc_fea = jax.random.normal(k3, (B, P, TOKEN_DIM), jnp.float32)    # (2, 64, 64)

    out = jax.block_until_ready(fuse_mamba_forward(kparams, dec_fea, enc_fea))
    assert out.shape == (B, P, TOKEN_DIM)

    ref = jax.block_until_ready(reference_forward(params, dec_fea, enc_fea))
    if not np.allclose(np.asarray(out), np.asarray(ref), atol=1e-2, rtol=1e-2):
        err = float(np.max(np.abs(np.asarray(out) - np.asarray(ref))))
        raise AssertionError(f"Pallas output does not match JAX reference (max err {err:.3e})")

    print("KERNEL_OK")
</pallas_src>

<mosaic_0001>
module attributes {stable_mosaic.version = 11 : i64} {
  func.func @fused_decoder_kernel(%arg0: i32, %arg1: memref<16x384xf32, #tpu.memory_space<vmem>>, %arg2: memref<64x64xf32, #tpu.memory_space<vmem>>, %arg3: memref<1x384xf32, #tpu.memory_space<vmem>>, %arg4: memref<1x384xf32, #tpu.memory_space<vmem>>, %arg5: memref<384x64xbf16, #tpu.memory_space<vmem>>, %arg6: memref<1x64xf32, #tpu.memory_space<vmem>>, %arg7: memref<64x64xbf16, #tpu.memory_space<vmem>>, %arg8: memref<1x64xf32, #tpu.memory_space<vmem>>, %arg9: memref<64x576xbf16, #tpu.memory_space<vmem>>, %arg10: memref<64x144xbf16, #tpu.memory_space<vmem>>, %arg11: memref<64x64xf32, #tpu.memory_space<vmem>>, %arg12: memref<128x64xbf16, #tpu.memory_space<vmem>>, %arg13: memref<1x64xf32, #tpu.memory_space<vmem>>, %arg14: memref<64x64xbf16, #tpu.memory_space<vmem>>, %arg15: memref<1x64xf32, #tpu.memory_space<vmem>>, %arg16: memref<64x64xf32, #tpu.memory_space<vmem>>) attributes {dimension_semantics = [#tpu.dimension_semantics<parallel>], iteration_bounds = array<i64: 2>, scalar_prefetch = 0 : i64, scratch_operands = 0 : i64, tpu.core_type = #tpu.core_type<tc>, window_params = [{transform_indices = @transform_0, window_bounds = array<i64: 16, 384>}, {transform_indices = @transform_1, window_bounds = array<i64: 64, 64>}, {pipeline_mode = #tpu.pipeline_mode<synchronous>, transform_indices = @transform_2, window_bounds = array<i64: 1, 384>}, {pipeline_mode = #tpu.pipeline_mode<synchronous>, transform_indices = @transform_3, window_bounds = array<i64: 1, 384>}, {pipeline_mode = #tpu.pipeline_mode<synchronous>, transform_indices = @transform_4, window_bounds = array<i64: 384, 64>}, {pipeline_mode = #tpu.pipeline_mode<synchronous>, transform_indices = @transform_5, window_bounds = array<i64: 1, 64>}, {pipeline_mode = #tpu.pipeline_mode<synchronous>, transform_indices = @transform_6, window_bounds = array<i64: 64, 64>}, {pipeline_mode = #tpu.pipeline_mode<synchronous>, transform_indices = @transform_7, window_bounds = array<i64: 1, 64>}, {pipeline_mode = #tpu.pipeline_mode<synchronous>, transform_indices = @transform_8, window_bounds = array<i64: 64, 576>}, {pipeline_mode = #tpu.pipeline_mode<synchronous>, transform_indices = @transform_9, window_bounds = array<i64: 64, 144>}, {pipeline_mode = #tpu.pipeline_mode<synchronous>, transform_indices = @transform_10, window_bounds = array<i64: 64, 64>}, {pipeline_mode = #tpu.pipeline_mode<synchronous>, transform_indices = @transform_11, window_bounds = array<i64: 128, 64>}, {pipeline_mode = #tpu.pipeline_mode<synchronous>, transform_indices = @transform_12, window_bounds = array<i64: 1, 64>}, {pipeline_mode = #tpu.pipeline_mode<synchronous>, transform_indices = @transform_13, window_bounds = array<i64: 64, 64>}, {pipeline_mode = #tpu.pipeline_mode<synchronous>, transform_indices = @transform_14, window_bounds = array<i64: 1, 64>}, {transform_indices = @transform_15, window_bounds = array<i64: 64, 64>}]} {
    %c0 = arith.constant 0 : index
    %c0_0 = arith.constant 0 : index
    %0 = vector.load %arg1[%c0, %c0_0] : memref<16x384xf32, #tpu.memory_space<vmem>>, vector<16x384xf32>
    %cst = arith.constant dense<0.000000e+00> : vector<16xf32>
    %1 = vector.multi_reduction <add>, %0, %cst [1] : vector<16x384xf32> to vector<16xf32>
    %2 = vector.shape_cast %1 : vector<16xf32> to vector<16x1xf32>
    %cst_1 = arith.constant 3.840000e+02 : f32
    %3 = vector.broadcast %cst_1 : f32 to vector<16x1xf32>
    %4 = arith.divf %2, %3 : vector<16x1xf32>
    %5 = vector.broadcast %4 : vector<16x1xf32> to vector<16x384xf32>
    %6 = arith.subf %0, %5 : vector<16x384xf32>
    %7 = arith.mulf %6, %6 : vector<16x384xf32>
    %cst_2 = arith.constant dense<0.000000e+00> : vector<16xf32>
    %8 = vector.multi_reduction <add>, %7, %cst_2 [1] : vector<16x384xf32> to vector<16xf32>
    %9 = vector.shape_cast %8 : vector<16xf32> to vector<16x1xf32>
    %cst_3 = arith.constant 3.840000e+02 : f32
    %10 = vector.broadcast %cst_3 : f32 to vector<16x1xf32>
    %11 = arith.divf %9, %10 : vector<16x1xf32>
    %cst_4 = arith.constant 9.99999974E-6 : f32
    %12 = vector.broadcast %cst_4 : f32 to vector<16x1xf32>
    %13 = arith.addf %11, %12 : vector<16x1xf32>
    %14 = math.rsqrt %13 : vector<16x1xf32>
    %15 = vector.broadcast %14 : vector<16x1xf32> to vector<16x384xf32>
    %16 = arith.mulf %6, %15 : vector<16x384xf32>
    %c0_5 = arith.constant 0 : index
    %c0_6 = arith.constant 0 : index
    %17 = vector.load %arg3[%c0_5, %c0_6] : memref<1x384xf32, #tpu.memory_space<vmem>>, vector<1x384xf32>
    %18 = vector.broadcast %17 : vector<1x384xf32> to vector<16x384xf32>
    %19 = arith.mulf %16, %18 : vector<16x384xf32>
    %c0_7 = arith.constant 0 : index
    %c0_8 = arith.constant 0 : index
    %20 = vector.load %arg4[%c0_7, %c0_8] : memref<1x384xf32, #tpu.memory_space<vmem>>, vector<1x384xf32>
    %21 = vector.broadcast %20 : vector<1x384xf32> to vector<16x384xf32>
    %22 = arith.addf %19, %21 : vector<16x384xf32>
    %23 = arith.truncf %22 : vector<16x384xf32> to vector<16x384xbf16>
    %c0_9 = arith.constant 0 : index
    %c0_10 = arith.constant 0 : index
    %24 = vector.load %arg5[%c0_9, %c0_10] : memref<384x64xbf16, #tpu.memory_space<vmem>>, vector<384x64xbf16>
    %cst_11 = arith.constant dense<0.000000e+00> : vector<16x64xf32>
    %25 = tpu.matmul %23, %24, %cst_11 {dimension_numbers = #tpu.dot_dimension_numbers<[1], [0], [0], [1], [0, 0, 1, 1], [], []>} : vector<16x384xbf16>, vector<384x64xbf16>, vector<16x64xf32> -> vector<16x64xf32>
    %c0_12 = arith.constant 0 : index
    %c0_13 = arith.constant 0 : index
    %26 = vector.load %arg6[%c0_12, %c0_13] : memref<1x64xf32, #tpu.memory_space<vmem>>, vector<1x64xf32>
    %27 = vector.broadcast %26 : vector<1x64xf32> to vector<16x64xf32>
    %28 = arith.addf %25, %27 : vector<16x64xf32>
    %cst_14 = arith.constant 5.000000e-01 : f32
    %29 = vector.broadcast %cst_14 : f32 to vector<16x64xf32>
    %30 = arith.mulf %29, %28 : vector<16x64xf32>
    %cst_15 = arith.constant 0.707106769 : f32
    %31 = vector.broadcast %cst_15 : f32 to vector<16x64xf32>
    %32 = arith.mulf %28, %31 : vector<16x64xf32>
    %33 = math.erf %32 : vector<16x64xf32>
    %cst_16 = arith.constant 1.000000e+00 : f32
    %34 = vector.broadcast %cst_16 : f32 to vector<16x64xf32>
    %35 = arith.addf %34, %33 : vector<16x64xf32>
    %36 = arith.mulf %30, %35 : vector<16x64xf32>
    %37 = arith.truncf %36 : vector<16x64xf32> to vector<16x64xbf16>
    %c0_17 = arith.constant 0 : index
    %c0_18 = arith.constant 0 : index
    %38 = vector.load %arg7[%c0_17, %c0_18] : memref<64x64xbf16, #tpu.memory_space<vmem>>, vector<64x64xbf16>
    %cst_19 = arith.constant dense<0.000000e+00> : vector<16x64xf32>
    %39 = tpu.matmul %37, %38, %cst_19 {dimension_numbers = #tpu.dot_dimension_numbers<[1], [0], [0], [1], [0, 0, 1, 1], [], []>} : vector<16x64xbf16>, vector<64x64xbf16>, vector<16x64xf32> -> vector<16x64xf32>
    %c0_20 = arith.constant 0 : index
    %c0_21 = arith.constant 0 : index
    %40 = vector.load %arg8[%c0_20, %c0_21] : memref<1x64xf32, #tpu.memory_space<vmem>>, vector<1x64xf32>
    %41 = vector.broadcast %40 : vector<1x64xf32> to vector<16x64xf32>
    %42 = arith.addf %39, %41 : vector<16x64xf32>
    %43 = arith.truncf %42 : vector<16x64xf32> to vector<16x64xbf16>
    %c0_22 = arith.constant 0 : index
    %c0_23 = arith.constant 0 : index
    %44 = vector.load %arg9[%c0_22, %c0_23] : memref<64x576xbf16, #tpu.memory_space<vmem>>, vector<64x576xbf16>
    %cst_24 = arith.constant dense<0.000000e+00> : vector<16x576xf32>
    %45 = tpu.matmul %43, %44, %cst_24 {dimension_numbers = #tpu.dot_dimension_numbers<[1], [0], [0], [1], [0, 0, 1, 1], [], []>} : vector<16x64xbf16>, vector<64x576xbf16>, vector<16x576xf32> -> vector<16x576xf32>
    %46 = vector.extract_strided_slice %45 {offsets = [0, 0], sizes = [16, 64], strides = [1, 1]} : vector<16x576xf32> to vector<16x64xf32>
    %47 = vector.extract_strided_slice %45 {offsets = [0, 64], sizes = [16, 64], strides = [1, 1]} : vector<16x576xf32> to vector<16x64xf32>
    %48 = vector.extract_strided_slice %45 {offsets = [0, 128], sizes = [16, 64], strides = [1, 1]} : vector<16x576xf32> to vector<16x64xf32>
    %49 = vector.extract_strided_slice %45 {offsets = [0, 192], sizes = [16, 64], strides = [1, 1]} : vector<16x576xf32> to vector<16x64xf32>
    %50 = vector.extract_strided_slice %45 {offsets = [0, 256], sizes = [16, 64], strides = [1, 1]} : vector<16x576xf32> to vector<16x64xf32>
    %51 = vector.extract_strided_slice %45 {offsets = [0, 320], sizes = [16, 64], strides = [1, 1]} : vector<16x576xf32> to vector<16x64xf32>
    %52 = vector.extract_strided_slice %45 {offsets = [0, 384], sizes = [16, 64], strides = [1, 1]} : vector<16x576xf32> to vector<16x64xf32>
    %53 = vector.extract_strided_slice %45 {offsets = [0, 448], sizes = [16, 64], strides = [1, 1]} : vector<16x576xf32> to vector<16x64xf32>
    %54 = vector.extract_strided_slice %45 {offsets = [0, 512], sizes = [16, 64], strides = [1, 1]} : vector<16x576xf32> to vector<16x64xf32>
    %55 = tpu.concatenate %46, %47, %48, %49, %50, %51, %52, %53, %54 in 0 : vector<16x64xf32>, vector<16x64xf32>, vector<16x64xf32>, vector<16x64xf32>, vector<16x64xf32>, vector<16x64xf32>, vector<16x64xf32>, vector<16x64xf32>, vector<16x64xf32> -> vector<144x64xf32>
    %c0_25 = arith.constant 0 : index
    %c0_26 = arith.constant 0 : index
    %56 = vector.load %arg10[%c0_25, %c0_26] : memref<64x144xbf16, #tpu.memory_space<vmem>>, vector<64x144xbf16>
    %57 = arith.extf %56 : vector<64x144xbf16> to vector<64x144xf32>
    %cst_27 = arith.constant dense<0.000000e+00> : vector<64x64xf32>
    %58 = tpu.matmul %57, %55, %cst_27 {dimension_numbers = #tpu.dot_dimension_numbers<[1], [0], [0], [1], [0, 0, 1, 1], [], []>} : vector<64x144xf32>, vector<144x64xf32>, vector<64x64xf32> -> vector<64x64xf32>
    %c0_28 = arith.constant 0 : index
    %c0_29 = arith.constant 0 : index
    %59 = vector.load %arg11[%c0_28, %c0_29] : memref<64x64xf32, #tpu.memory_space<vmem>>, vector<64x64xf32>
    %60 = arith.addf %58, %59 : vector<64x64xf32>
    %c0_30 = arith.constant 0 : index
    %c0_31 = arith.constant 0 : index
    %61 = vector.load %arg2[%c0_30, %c0_31] : memref<64x64xf32, #tpu.memory_space<vmem>>, vector<64x64xf32>
    %62 = tpu.concatenate %60, %61 in 1 : vector<64x64xf32>, vector<64x64xf32> -> vector<64x128xf32>
    %63 = arith.truncf %62 : vector<64x128xf32> to vector<64x128xbf16>
    %c0_32 = arith.constant 0 : index
    %c0_33 = arith.constant 0 : index
    %64 = vector.load %arg12[%c0_32, %c0_33] : memref<128x64xbf16, #tpu.memory_space<vmem>>, vector<128x64xbf16>
    %cst_34 = arith.constant dense<0.000000e+00> : vector<64x64xf32>
    %65 = tpu.matmul %63, %64, %cst_34 {dimension_numbers = #tpu.dot_dimension_numbers<[1], [0], [0], [1], [0, 0, 1, 1], [], []>} : vector<64x128xbf16>, vector<128x64xbf16>, vector<64x64xf32> -> vector<64x64xf32>
    %c0_35 = arith.constant 0 : index
    %c0_36 = arith.constant 0 : index
    %66 = vector.load %arg13[%c0_35, %c0_36] : memref<1x64xf32, #tpu.memory_space<vmem>>, vector<1x64xf32>
    %67 = vector.broadcast %66 : vector<1x64xf32> to vector<64x64xf32>
    %68 = arith.addf %65, %67 : vector<64x64xf32>
    %cst_37 = arith.constant 5.000000e-01 : f32
    %69 = vector.broadcast %cst_37 : f32 to vector<64x64xf32>
    %70 = arith.mulf %69, %68 : vector<64x64xf32>
    %cst_38 = arith.constant 0.707106769 : f32
    %71 = vector.broadcast %cst_38 : f32 to vector<64x64xf32>
    %72 = arith.mulf %68, %71 : vector<64x64xf32>
    %73 = math.erf %72 : vector<64x64xf32>
    %cst_39 = arith.constant 1.000000e+00 : f32
    %74 = vector.broadcast %cst_39 : f32 to vector<64x64xf32>
    %75 = arith.addf %74, %73 : vector<64x64xf32>
    %76 = arith.mulf %70, %75 : vector<64x64xf32>
    %77 = arith.truncf %76 : vector<64x64xf32> to vector<64x64xbf16>
    %c0_40 = arith.constant 0 : index
    %c0_41 = arith.constant 0 : index
    %78 = vector.load %arg14[%c0_40, %c0_41] : memref<64x64xbf16, #tpu.memory_space<vmem>>, vector<64x64xbf16>
    %cst_42 = arith.constant dense<0.000000e+00> : vector<64x64xf32>
    %79 = tpu.matmul %77, %78, %cst_42 {dimension_numbers = #tpu.dot_dimension_numbers<[1], [0], [0], [1], [0, 0, 1, 1], [], []>} : vector<64x64xbf16>, vector<64x64xbf16>, vector<64x64xf32> -> vector<64x64xf32>
    %c0_43 = arith.constant 0 : index
    %c0_44 = arith.constant 0 : index
    %80 = vector.load %arg15[%c0_43, %c0_44] : memref<1x64xf32, #tpu.memory_space<vmem>>, vector<1x64xf32>
    %81 = vector.broadcast %80 : vector<1x64xf32> to vector<64x64xf32>
    %82 = arith.addf %79, %81 : vector<64x64xf32>
    %c0_45 = arith.constant 0 : index
    %c0_46 = arith.constant 0 : index
    %83 = vector.load %arg16[%c0_45, %c0_46] : memref<64x64xf32, #tpu.memory_space<vmem>>, vector<64x64xf32>
    tpu.vector_store %arg16[%c0_45, %c0_46], %82 {strides = array<i32>} : memref<64x64xf32, #tpu.memory_space<vmem>>, vector<64x64xf32>,
    return
  }
  func.func @transform_0(%arg0: i32) -> (i32, i32) {
    %c0_i32 = arith.constant 0 : i32
    %c0_i32_0 = arith.constant 0 : i32
    return %arg0, %c0_i32 : i32, i32
  }
  func.func @transform_1(%arg0: i32) -> (i32, i32) {
    %c0_i32 = arith.constant 0 : i32
    %c0_i32_0 = arith.constant 0 : i32
    return %arg0, %c0_i32 : i32, i32
  }
  func.func @transform_2(%arg0: i32) -> (i32, i32) {
    %c0_i32 = arith.constant 0 : i32
    %c0_i32_0 = arith.constant 0 : i32
    %c0_i32_1 = arith.constant 0 : i32
    return %c0_i32, %c0_i32_0 : i32, i32
  }
  func.func @transform_3(%arg0: i32) -> (i32, i32) {
    %c0_i32 = arith.constant 0 : i32
    %c0_i32_0 = arith.constant 0 : i32
    %c0_i32_1 = arith.constant 0 : i32
    return %c0_i32, %c0_i32_0 : i32, i32
  }
  func.func @transform_4(%arg0: i32) -> (i32, i32) {
    %c0_i32 = arith.constant 0 : i32
    %c0_i32_0 = arith.constant 0 : i32
    %c0_i32_1 = arith.constant 0 : i32
    return %c0_i32, %c0_i32_0 : i32, i32
  }
  func.func @transform_5(%arg0: i32) -> (i32, i32) {
    %c0_i32 = arith.constant 0 : i32
    %c0_i32_0 = arith.constant 0 : i32
    %c0_i32_1 = arith.constant 0 : i32
    return %c0_i32, %c0_i32_0 : i32, i32
  }
  func.func @transform_6(%arg0: i32) -> (i32, i32) {
    %c0_i32 = arith.constant 0 : i32
    %c0_i32_0 = arith.constant 0 : i32
    %c0_i32_1 = arith.constant 0 : i32
    return %c0_i32, %c0_i32_0 : i32, i32
  }
  func.func @transform_7(%arg0: i32) -> (i32, i32) {
    %c0_i32 = arith.constant 0 : i32
    %c0_i32_0 = arith.constant 0 : i32
    %c0_i32_1 = arith.constant 0 : i32
    return %c0_i32, %c0_i32_0 : i32, i32
  }
  func.func @transform_8(%arg0: i32) -> (i32, i32) {
    %c0_i32 = arith.constant 0 : i32
    %c0_i32_0 = arith.constant 0 : i32
    %c0_i32_1 = arith.constant 0 : i32
    return %c0_i32, %c0_i32_0 : i32, i32
  }
  func.func @transform_9(%arg0: i32) -> (i32, i32) {
    %c0_i32 = arith.constant 0 : i32
    %c0_i32_0 = arith.constant 0 : i32
    %c0_i32_1 = arith.constant 0 : i32
    return %c0_i32, %c0_i32_0 : i32, i32
  }
  func.func @transform_10(%arg0: i32) -> (i32, i32) {
    %c0_i32 = arith.constant 0 : i32
    %c0_i32_0 = arith.constant 0 : i32
    %c0_i32_1 = arith.constant 0 : i32
    return %c0_i32, %c0_i32_0 : i32, i32
  }
  func.func @transform_11(%arg0: i32) -> (i32, i32) {
    %c0_i32 = arith.constant 0 : i32
    %c0_i32_0 = arith.constant 0 : i32
    %c0_i32_1 = arith.constant 0 : i32
    return %c0_i32, %c0_i32_0 : i32, i32
  }
  func.func @transform_12(%arg0: i32) -> (i32, i32) {
    %c0_i32 = arith.constant 0 : i32
    %c0_i32_0 = arith.constant 0 : i32
    %c0_i32_1 = arith.constant 0 : i32
    return %c0_i32, %c0_i32_0 : i32, i32
  }
  func.func @transform_13(%arg0: i32) -> (i32, i32) {
    %c0_i32 = arith.constant 0 : i32
    %c0_i32_0 = arith.constant 0 : i32
    %c0_i32_1 = arith.constant 0 : i32
    return %c0_i32, %c0_i32_0 : i32, i32
  }
  func.func @transform_14(%arg0: i32) -> (i32, i32) {
    %c0_i32 = arith.constant 0 : i32
    %c0_i32_0 = arith.constant 0 : i32
    %c0_i32_1 = arith.constant 0 : i32
    return %c0_i32, %c0_i32_0 : i32, i32
  }
  func.func @transform_15(%arg0: i32) -> (i32, i32) {
    %c0_i32 = arith.constant 0 : i32
    %c0_i32_0 = arith.constant 0 : i32
    return %arg0, %c0_i32 : i32, i32
  }
}

</mosaic_0001>

<bundles_post_ra>
// kernel: fuse_mamba_forward.1
= control target key start
LH: loop header
LB: loop body
LE: loop exit
PB: predicated region body
PF: predicated region fallthrough
CT: control target
= control target key end

     0   :  { %s3375_s0 = inlined_call_operand.hbm [shape: f32[32,384], index: 0, kind: input, shape index: {}]   ;;  %s3376_s1 = inlined_call_operand.vmem [shape: f32[128,64], index: 1, kind: input, shape index: {}]   ;;  %s3377_s2 = inlined_call_operand.vmem [shape: f32[1,384], index: 2, kind: input, shape index: {}]   ;;  %s3378_s3 = inlined_call_operand.vmem [shape: f32[1,384], index: 3, kind: input, shape index: {}]   ;;  %s3379_s4 = inlined_call_operand.vmem [shape: bf16[384,64], index: 4, kind: input, shape index: {}]   ;;  %s3380_s5 = inlined_call_operand.vmem [shape: f32[1,64], index: 5, kind: input, shape index: {}]   ;;  %s3381_s6 = inlined_call_operand.vmem [shape: bf16[64,64], index: 6, kind: input, shape index: {}]   ;;  %s3382_s7 = inlined_call_operand.vmem [shape: f32[1,64], index: 7, kind: input, shape index: {}]   ;;  %s3383_s8 = inlined_call_operand.vmem [shape: bf16[64,576], index: 8, kind: input, shape index: {}]   ;;  %s3384_s9 = inlined_call_operand.hbm [shape: bf16[64,144], index: 9, kind: input, shape index: {}]   ;;  %s3385_s10 = inlined_call_operand.hbm [shape: f32[64,64], index: 10, kind: input, shape index: {}]   ;;  %s3386_s11 = inlined_call_operand.vmem [shape: bf16[128,64], index: 11, kind: input, shape index: {}]   ;;  %s3387_s12 = inlined_call_operand.vmem [shape: f32[1,64], index: 12, kind: input, shape index: {}]   ;;  %s3388_s13 = inlined_call_operand.hbm [shape: bf16[64,64], index: 13, kind: input, shape index: {}]   ;;  %s3389_s14 = inlined_call_operand.vmem [shape: f32[1,64], index: 14, kind: input, shape index: {}]   ;;  %s3390_s15 = inlined_call_operand.hbm [shape: f32[128,64], index: 15, kind: output, shape index: {}]  }
   0x1   :  { %3398 = sst [smem:[#allocation17_spill]] %s3376_s1 }
   0x2   :  { %3399 = sst [smem:[#allocation18_spill]] %s3380_s5 }
   0x3   :  { %3400 = sst [smem:[#allocation19_spill]] %s3382_s7 }
   0x4   :  { %3401 = sst [smem:[#allocation20_spill]] %s3386_s11 }
   0x5   :  { %3402 = sst [smem:[#allocation21_spill]] %s3387_s12 }
   0x6   :  { %3403 = sst [smem:[#allocation22_spill]] %s3389_s14 }
   0x7   :  { %3404 = sst [smem:[#allocation23_spill]] %s3390_s15 }
   0x8   :  { %20 = vsyncpa [#allocation3], 0 }
   0x9   :  { %22 = vsyncpa [#allocation3 + $0x1], 0 }
   0xa   :  { %23 = vsyncpa [#allocation6], 0 }
   0xb   :  { %24 = vsyncpa [#allocation9], 0 }
   0xc   :  { %25 = vsyncpa [#allocation4], 0 }
   0xd   :  { %27 = vsyncpa [#allocation4 + $0x1], 0  ;;  %s2781_s18 = smov 0   ;;  %s2783_s19 = smov 0  }
   0xe   :  { %s2785_s20 = smov 0   ;;  %s2787_s21 = smov 0  }
   0xf LB: > { %3405 = sst [smem:[#allocation15_spill]] %s2669_s18  ;;  %s2802_s22 = sadd.s32 4294967295, %s2681_s21   ;;  %s2681_s21 = sphi %s2787_s21, %s3435_s21   ;;  %s2677_s20 = sphi %s2785_s20, %s3434_s20   ;;  %s2673_s19 = sphi %s2783_s19, %s3433_s19   ;;  %s2669_s18 = sphi %s2781_s18, %s3432_s18  }
  0x10   : > { %s1994_s23 = sadd.s32 4294967294, %s2681_s21   ;;  %p53_p0 = scmp.ne.s32.totalorder %s2673_s19, %s2669_s18 }
  0x11   : > { %p3394_p1 = scmp.eq.s32.totalorder %s2802_s22, 0  ;;  %p382_p3 = scmp.eq.s32.totalorder %s1994_s23, 1 }
  0x12   : > { %p1995_p5 = scmp.ge.s32.totalorder %s2681_s21, 1  ;;  %p389_p7 = scmp.lt.s32.totalorder %s2681_s21, 3 }
  0x13   : > { %p2811_p4 = por %p3394_p1, %p53_p0  ;;  %p2816_p6 = por %p382_p3, %p53_p0 }
  0x14   : > { %p2821_p8 = pnand %p1995_p5, %p389_p7  ;;  %s2683_s27 = smov [#allocation5]  }
  0x15   : > { %s3406_s24 = scalar_select %p2811_p4, 1, 0 }
  0x16   : > { %s3407_s25 = scalar_select %p2816_p6, 1, 0 }
  0x17   : > { %s3409_s26 = scalar_select %p2821_p8, 1, 0 }
  0x18   : > { %3408 = sst [smem:[#allocation16_spill]] %s3407_s25  ;;  %s422_s28 = sshll.u32 %s2683_s27, 4  ;;  %s2825_s28 = int_to_ptr.vmem [resolvable:$true] %s422_s28 }
  0x19   : > { %p2287_p9 = pneg %p2821_p8  ;;  %s2684_s30 = smov [#allocation7]  }
  0x1a   : > { %s435_s16 = sshll.u32 %s2684_s30, 4  ;;  %s2685_s17 = smov [#allocation8]   ;;  %s2836_s16 = int_to_ptr.vmem [resolvable:$true] %s435_s16 }
  0x1b   : > { %p2832_p11 = pnand %p2287_p9, %p3394_p1  ;;  %s2838_s23 = sshll.u32 %s2685_s17, 4  ;;  %s455_s23 = int_to_ptr.vmem [resolvable:$true] %s2838_s23 }
  0x1c   : > { %s2493_s18 = scalar_lea.hbm %s3384_s9, 1024 }
  0x1d   : > { %p2494_p12 = scmp.ne.s32.totalorder %s3384_s9, %s2493_s18  ;;  %p2848_p13 = pneg %p2832_p11 }
  0x1e   : > { %p2500_p5 = scmp.lt.u32.totalorder %s2493_s18, %s3384_s9 }
  0x1f   : > { %p2496_p0 = pnand %p2848_p13, %p2494_p12 }
  0x21   : > { %p2497_p3 = pneg %p2496_p0 }
  0x23   : > { %p2502_p7 = pnand %p2500_p5, %p2497_p3 }
  0x25   : > { %2505 = shalt.err (!%p2502_p7)
}
  0x26   : > { %s2506_s14 = scalar_lea.vmem %s2825_s28, 1024  ;;  %p2514_p2 = scmp.lt.s32.totalorder %s2825_s28, %s2825_s28 }
  0x27   : > { %p2507_p9 = scmp.ne.s32.totalorder %s2825_s28, %s2506_s14  ;;  %p2515_p6 = scmp.lt.s32.totalorder %s2506_s14, %s2506_s14 }
  0x29   : > { %p2509_p10 = pnand %p2507_p9, %p2848_p13  ;;  %p2516_p12 = por %p2515_p6, %p2514_p2 }
  0x2b   : > { %p2510_p1 = pneg %p2509_p10 }
  0x2d   : > { %p2517_p0 = pnand %p2516_p12, %p2510_p1 }
  0x2f   : > { %2520 = shalt.err (!%p2517_p0)
}
  0x30   : > { %s2686_s15 = smov 128   ;;  %s2687_s18 = smov 8  }
  0x31   : > { %2290 = dma.hbm_to_vmem [thread:$0]  (!%p2832_p11), %s3384_s9, 1024, %s2825_s28, [#allocation6], %s2686_s15, %s2686_s15, %s2687_s18  }
  0x32   : > { %s2521_s1 = scalar_lea.hbm %s3385_s10, 1024 }
  0x33   : > { %p2522_p2 = scmp.ne.s32.totalorder %s3385_s10, %s2521_s1  ;;  %p2528_p10 = scmp.lt.u32.totalorder %s2521_s1, %s3385_s10 }
  0x35   : > { %p2524_p1 = pnand %p2522_p2, %p2848_p13 }
  0x37   : > { %p2525_p6 = pneg %p2524_p1 }
  0x39   : > { %p2530_p3 = pnand %p2528_p10, %p2525_p6 }
  0x3b   : > { %2533 = shalt.err (!%p2530_p3)
}
  0x3c   : > { %s2534_s28 = scalar_lea.vmem %s2836_s16, 1024  ;;  %p2542_p12 = scmp.lt.s32.totalorder %s2836_s16, %s2836_s16 }
  0x3d   : > { %p2535_p5 = scmp.ne.s32.totalorder %s2836_s16, %s2534_s28  ;;  %p2543_p0 = scmp.lt.s32.totalorder %s2534_s28, %s2534_s28 }
  0x3f   : > { %p2537_p7 = pnand %p2535_p5, %p2848_p13  ;;  %p2544_p2 = por %p2543_p0, %p2542_p12 }
  0x41   : > { %p2538_p9 = pneg %p2537_p7 }
  0x43   : > { %p2545_p1 = pnand %p2544_p2, %p2538_p9 }
  0x45   : > { %2548 = shalt.err (!%p2545_p1)
}
  0x46   : > { %2293 = dma.hbm_to_vmem [thread:$0]  (!%p2832_p11), %s3385_s10, 1024, %s2836_s16, [#allocation6], %s2686_s15, %s2686_s15, %s2687_s18  }
  0x47   : > { %s2549_s25 = scalar_lea.hbm %s3388_s13, 512 }
  0x48   : > { %p2550_p6 = scmp.ne.s32.totalorder %s3388_s13, %s2549_s25  ;;  %p2556_p5 = scmp.lt.u32.totalorder %s2549_s25, %s3388_s13 }
  0x4a   : > { %p2552_p10 = pnand %p2550_p6, %p2848_p13 }
  0x4c   : > { %p2553_p3 = pneg %p2552_p10 }
  0x4e   : > { %p2558_p7 = pnand %p2556_p5, %p2553_p3 }
  0x50   : > { %2561 = shalt.err (!%p2558_p7)
}
  0x51   : > { %s2562_s28 = scalar_lea.vmem %s455_s23, 512  ;;  %p2570_p2 = scmp.lt.s32.totalorder %s455_s23, %s455_s23 }
  0x52   : > { %p2563_p9 = scmp.ne.s32.totalorder %s455_s23, %s2562_s28  ;;  %p2571_p1 = scmp.lt.s32.totalorder %s2562_s28, %s2562_s28 }
  0x54   : > { %p2565_p12 = pnand %p2563_p9, %p2848_p13  ;;  %p2572_p4 = por %p2571_p1, %p2570_p2 }
  0x56   : > { %p2566_p0 = pneg %p2565_p12 }
  0x58   : > { %p2573_p8 = pnand %p2572_p4, %p2566_p0 }
  0x5a   : > { %2576 = shalt.err (!%p2573_p8)
}
  0x5b   : > { %s2688_s16 = smov 64   ;;  %s2689_s12 = smov 4  }
  0x5c   : > { %2296 = dma.hbm_to_vmem [thread:$0]  (!%p2832_p11), %s3388_s13, 512, %s455_s23, [#allocation9], %s2688_s16, %s2688_s16, %s2689_s12  }
  0x5d   : > { %s2912_s1 = sadd.s32 1, %s2681_s21   ;;  %s40_s7 = sadd.s32 1, %s2677_s20 }
  0x5e   : > { %s37_s5 = ssub.s32 %s2681_s21, %s2912_s1  ;;  %p47_p8 = scmp.ne.s32.totalorder %s2677_s20, %s2673_s19 }
  0x5f   : > { %p38_p4 = scmp.eq.s32.totalorder %s37_s5, 0  ;;  %p48_p13 = scmp.eq.s32.totalorder %s2681_s21, 0 }
  0x60   : > { %p2308_p6 = scmp.lt.s32.totalorder %s2681_s21, 2  ;;  %p3412_p3 = scmp.eq.s32.totalorder %s2802_s22, 1 }
  0x61   : > { %s2922_s11 = scalar_select %p38_p4, %s2677_s20, %s40_s7  }
  0x62   : > { %p49_p10 = por %p48_p13, %p47_p8  ;;  %p2926_p5 = por %p3412_p3, %p47_p8 }
  0x63   : > { %s471_s29 = sand.u32 1, %s2677_s20   ;;  %s2269_s27 = smul.u32 768, %s2681_s21 }
  0x64   : > { %s2268_s23 = smul.u32 48, %s471_s29  ;;  %p2937_p11 = pnand %p2308_p6, %p49_p10 }
  0x65   : > { %s2935_s14 = scalar_lea.hbm %s3375_s0, %s2269_s27  ;;  %s2943_s15 = scalar_lea.sflag [#allocation3], %s471_s29 }
  0x66   : > { %s475_s16 = scalar_lea.vmem [#allocation2], %s2268_s23  ;;  %s2577_s18 = scalar_lea.hbm %s2935_s14, 768 }
  0x67   : > { %s483_s12 = sshll.u32 %s475_s16, 4  ;;  %p2578_p7 = scmp.ne.s32.totalorder %s2935_s14, %s2577_s18  ;;  %s2941_s12 = int_to_ptr.vmem [resolvable:$true] %s483_s12 }
  0x68   : > { %p2579_p9 = pneg %p2937_p11  ;;  %s2582_s27 = scalar_lea.hbm %s3375_s0, 1536 }
  0x69   : > { %p2583_p2 = scmp.lt.u32.totalorder %s2935_s14, %s3375_s0  ;;  %p2584_p1 = scmp.lt.u32.totalorder %s2582_s27, %s2577_s18 }
  0x6a   : > { %p2580_p12 = pnand %p2579_p9, %p2578_p7  ;;  %p2586_p8 = scmp.lt.u32.totalorder %s2577_s18, %s2935_s14 }
  0x6b   : > { %p2585_p4 = por %p2584_p1, %p2583_p2 }
  0x6c   : > { %p2581_p0 = pneg %p2580_p12 }
  0x6d   : > { %p2587_p13 = por %p2586_p8, %p2585_p4 }
  0x6f   : > { %p2588_p6 = pnand %p2587_p13, %p2581_p0 }
  0x71   : > { %2591 = shalt.err (!%p2588_p6)
}
  0x72   : > { %s2592_s29 = scalar_lea.vmem %s2941_s12, 768  ;;  %s2690_s23 = smov [#allocation2]  }
  0x73   : > { %p2593_p10 = scmp.ne.s32.totalorder %s2941_s12, %s2592_s29  ;;  %s2597_s16 = sshll.u32 %s2690_s23, 4  ;;  %s2598_s16 = int_to_ptr.vmem [resolvable:$false] %s2597_s16 }
  0x74   : > { %s2599_s5 = scalar_lea.vmem %s2598_s16, 1536  ;;  %p2600_p12 = scmp.lt.s32.totalorder %s2941_s12, %s2598_s16 }
  0x75   : > { %p2595_p3 = pnand %p2593_p10, %p2579_p9  ;;  %p2601_p2 = scmp.lt.s32.totalorder %s2599_s5, %s2592_s29 }
  0x77   : > { %p2596_p7 = pneg %p2595_p3  ;;  %p2602_p1 = por %p2601_p2, %p2600_p12 }
  0x79   : > { %p2603_p4 = pnand %p2602_p1, %p2596_p7 }
  0x7b   : > { %2606 = shalt.err (!%p2603_p4)
}
  0x7c   : > { %s2691_s18 = smov 384   ;;  %s2692_s7 = smov 24  }
  0x7d   : > { %2300 = dma.hbm_to_vmem [thread:$0]  (!%p2937_p11), %s2935_s14, 768, %s2941_s12, %s2943_s15, %s2691_s18, %s2691_s18, %s2692_s7  }
  0x7e   : > { %p3415_p9 = scmp.ne.s32.totalorder %s3409_s26, 0 }
  0x7f   : > { %s2974_s27 = sand.u32 (!%p3415_p9), 1, %s2673_s19   ;;  %p3416_p0 = scmp.ne.s32.totalorder (!%p3415_p9), %s3406_s24, 0 }
  0x80   : > { %504 = sbr.rel (%p3415_p9) target bundleno = 2007 (0x7d7), region = 80  ;;  %s507_s17 = scalar_lea.sflag (!%p3415_p9), [#allocation3], %s2974_s27 }
  0x81   : > { %s2270_s30 = smul.u32 (!%p3415_p9), 48, %s2974_s27 }
  0x83   : > { %s510_s29 = scalar_lea.vmem (!%p3415_p9), [#allocation2], %s2270_s30 }
  0x87   : > { %2652 = dma.done.wait (%p3416_p0), %s507_s17, 768  }
  0x88   : > { %2654 = vsyncadd (%p3416_p0), %s507_s17, 4294966528  ;;  %p3417_p8 = scmp.eq.s32.totalorder %s2802_s22, 0 }
  0x8a   : > { %2656 = dma.done.wait (%p3417_p8), [#allocation6], 2048   ;;  %p3418_p11 = pmov %p3417_p8 }
  0x8b   : > { %p3419_p13 = pmov %p3417_p8 }
  0x8c   : > { %2658 = vsyncadd (%p3418_p11), [#allocation6], 4294965248 }
  0x8d   : > { %2660 = dma.done.wait (%p3419_p13), [#allocation9], 512   ;;  %p3420_p6 = pmov %p3417_p8 }
  0x8e   : > { %v583_v0 = vld [vmem:[%s510_s29] sm:$0xff]  ;;  %v584_v1 = vld [vmem:[%s510_s29 + $0x8] sm:$0xff]  ;;  %v585_v2 = vld [vmem:[%s510_s29 + $0x10] sm:$0xff]  ;;  %v2693_v13 = vmov 0.0   ;;  %vm2694_vm0 = vmmov 0   ;;  %v634_v59 = vlaneseq  ;;  %s3421_s23 = sld [smem:[#allocation18_spill]] }
  0x8f   : > { %2662 = vsyncadd (%p3420_p6), [#allocation9], 4294966784  ;;  %v589_v3 = vadd.f32 %v584_v1, %v583_v0  ;;  %v586_v4 = vld [vmem:[%s510_s29 + $0x18] sm:$0xff]  ;;  %v587_v5 = vld [vmem:[%s510_s29 + $0x20] sm:$0xff]  ;;  %2157 = vmatprep.subr.bf16.mxu1 %v2693_v13  ;;  %2173 = vmatprep.mubr.msk.bf16.mxu1 %vm2694_vm0, %v2693_v13  ;;  %vm1012_vm1 = vcmask 523264   ;;  %s2697_s5 = smov 64  }
  0x90   : > { %v588_v6 = vld [vmem:[%s510_s29 + $0x28] sm:$0xff]  ;;  %v593_v7 = vadd.f32 %v587_v5, %v586_v4  ;;  %v2401_v10 = vld [vmem:[%s3379_s4 + $0x40] sm:$0xff]   ;;  %v2407_v37 = vld [vmem:[%s3379_s4 + $0x50] sm:$0xff]   ;;  %v635_v62 = vshrl.u32 %v634_v59, 7  ;;  %s3422_s29 = sld [smem:[#allocation19_spill]]  ;;  %vm1380_vm2 = vcmask 130048  }
  0x91   : > { %v590_v8 = vadd.f32 %v589_v3, %v585_v2  ;;  %v2402_v11 = vld [vmem:[%s3379_s4 + $0x80] sm:$0xff]   ;;  %2096 = vmatprep.subr.bf16.mxu0 %v2401_v10  ;;  %v2404_v34 = vld [vmem:[%s3379_s4 + $0x48] sm:$0xff]   ;;  %v2408_v38 = vld [vmem:[%s3379_s4 + $0x90] sm:$0xff]   ;;  %s2008_s18 = sshll.u32 %s2802_s22, 3  ;;  %s3423_s17 = sld [smem:[#allocation20_spill]] }
  0x92   : > { %v594_v9 = vadd.f32 %v593_v7, %v588_v6  ;;  %v2403_v12 = vld [vmem:[%s3379_s4] sm:$0xff]   ;;  %2158 = vmatpush3.bf16.msra.mxu1 %v2402_v11  ;;  %v2405_v35 = vld [vmem:[%s3379_s4 + $0x88] sm:$0xff]   ;;  %v2409_v39 = vld [vmem:[%s3379_s4 + $0x10] sm:$0xff]   ;;  %v640_v63 = vsub.s32 1, %v635_v62  ;;  %p576_p10 = scmp.lt.s32.totalorder %s2008_s18, 15  ;;  %s2007_s7 = sshll.u32 %s2974_s27, 6 }
  0x93   : > { %591 = vadd.xlane.f32.xlu0 %v590_v8  ;;  %2097 = vmatpush3.bf16.msra.mxu0 %v2403_v12  ;;  %v2406_v36 = vld [vmem:[%s3379_s4 + $0x8] sm:$0xff]   ;;  %v2410_v40 = vld [vmem:[%s3379_s4 + $0x58] sm:$0xff]   ;;  %v2413_v43 = vld [vmem:[%s3379_s4 + $0x60] sm:$0xff]   ;;  %s2095_s24 = sshll.u32 %s2802_s22, 10  ;;  %s3427_s12 = sld [smem:[#allocation23_spill]] }
  0x94   : > { %2159 = vmatprep.subr.bf16.mxu1 %v2693_v13  ;;  %2098 = vmatprep.subr.bf16.mxu0 %v2404_v34  ;;  %v2411_v41 = vld [vmem:[%s3379_s4 + $0x98] sm:$0xff]   ;;  %v2414_v44 = vld [vmem:[%s3379_s4 + $0xa0] sm:$0xff]   ;;  %v2416_v46 = vld [vmem:[%s3379_s4 + $0x68] sm:$0xff]   ;;  %s3437_s18 = smov (!%p576_p10, %s2008_s18), 15  ;;  %s1867_s22 = scalar_lea.sflag [#allocation4], %s2974_s27 }
  0x95   : > { %v2412_v42 = vld [vmem:[%s3379_s4 + $0x18] sm:$0xff]   ;;  %v2415_v45 = vld [vmem:[%s3379_s4 + $0x20] sm:$0xff]   ;;  %v2417_v47 = vld [vmem:[%s3379_s4 + $0xa8] sm:$0xff]   ;;  %s2009_s28 = sshll.u32 %s3437_s18, 3  ;;  %s3426_s18 = sld [smem:[#allocation22_spill]] }
  0x96   : > { %2160 = vmatpush3.bf16.msra.mxu1 %v2405_v35  ;;  %v2418_v48 = vld [vmem:[%s3379_s4 + $0x28] sm:$0xff]   ;;  %v2419_v49 = vld [vmem:[%s3379_s4 + $0x70] sm:$0xff]   ;;  %v2422_v52 = vld [vmem:[%s3379_s4 + $0x78] sm:$0xff]  }
  0x97   : > { %595 = vadd.xlane.f32.xlu0 %v594_v9  ;;  %2099 = vmatpush3.bf16.msra.mxu0 %v2406_v36  ;;  %v2420_v50 = vld [vmem:[%s3379_s4 + $0xb0] sm:$0xff]   ;;  %v2423_v53 = vld [vmem:[%s3379_s4 + $0xb8] sm:$0xff]  }
  0x98   : > { %2161 = vmatprep.subr.bf16.mxu1 %v2693_v13  ;;  %2100 = vmatprep.subr.bf16.mxu0 %v2407_v37  ;;  %v2421_v51 = vld [vmem:[%s3379_s4 + $0x30] sm:$0xff]   ;;  %v2424_v54 = vld [vmem:[%s3379_s4 + $0x38] sm:$0xff]  }
  0x99   : > { %v2427_v36 = vld [vmem:[%s3381_s6 + $0x10] sm:$0xff]   ;;  %v2428_v37 = vld [vmem:[%s3381_s6 + $0x18] sm:$0xff]   ;;  %s3326_s15 = scalar_lea.hbm %s3427_s12, %s2095_s24 }
  0x9a   : > { %2162 = vmatpush3.bf16.msra.mxu1 %v2408_v38  ;;  %v2429_v38 = vld [vmem:[%s3383_s8] ss:$20 sps:$4 sm:$0xff]  }
  0x9b   : > { %2101 = vmatpush3.bf16.msra.mxu0 %v2409_v39  ;;  %2163 = vmatprep.subr.bf16.mxu1 %v2693_v13  ;;  %v2431_v39 = vld [vmem:[%s3383_s8 + $0x4] ss:$20 sps:$4 sm:$0xff]  }
  0x9c   : > { %2102 = vmatprep.subr.bf16.mxu0 %v2410_v40  ;;  %v2434_v40 = vld [vmem:[%s3383_s8 + $0xc] ss:$20 sps:$4 sm:$0xff]  }
  0x9e   : > { %2164 = vmatpush3.bf16.msra.mxu1 %v2411_v41  ;;  %v2437_v41 = vld [vmem:[%s3383_s8 + $0x2c] ss:$20 sps:$4 sm:$0xff]  }
  0x9f   : > { %2103 = vmatpush3.bf16.msra.mxu0 %v2412_v42  ;;  %2165 = vmatprep.subr.bf16.mxu1 %v2693_v13  ;;  %v2435_v42 = vld [vmem:[%s3383_s8 + $0x28] ss:$20 sps:$4 sm:$0xff]  }
  0xa0   : > { %2104 = vmatprep.subr.bf16.mxu0 %v2413_v43  ;;  %v2443_v43 = vld [vmem:[%s3383_s8 + $0x54] ss:$20 sps:$4 sm:$0xff]  }
  0xa2   : > { %2166 = vmatpush3.bf16.msra.mxu1 %v2414_v44  ;;  %v2441_v44 = vld [vmem:[%s3383_s8 + $0x50] ss:$20 sps:$4 sm:$0xff]  }
  0xa3   : > { %2105 = vmatpush3.bf16.msra.mxu0 %v2415_v45  ;;  %2167 = vmatprep.subr.bf16.mxu1 %v2693_v13 }
  0xa4   : > { %2106 = vmatprep.subr.bf16.mxu0 %v2416_v46 }
  0xa6   : > { %2168 = vmatpush3.bf16.msra.mxu1 %v2417_v47 }
  0xa7   : > { %2107 = vmatpush3.bf16.msra.mxu0 %v2418_v48  ;;  %2169 = vmatprep.subr.bf16.mxu1 %v2693_v13  ;;  %v2010_v48 = vld [vmem:[%s3421_s23] ss:$0 sm:$0xff]  ;;  %s3424_s23 = sld [smem:[#allocation17_spill]] }
  0xa8   : > { %2108 = vmatprep.subr.bf16.mxu0 %v2419_v49 }
  0xaa   : > { %2170 = vmatpush3.bf16.msra.mxu1 %v2420_v50 }
  0xab   : > { %2109 = vmatpush3.bf16.msra.mxu0 %v2421_v51  ;;  %2171 = vmatprep.subr.bf16.mxu1 %v2693_v13 }
  0xac   : > { %2110 = vmatprep.subr.bf16.mxu0 %v2422_v52 }
  0xad   : > { %s579_s16 = scalar_lea.vmem %s3424_s23, %s2009_s28 }
  0xae   : > { %2172 = vmatpush3.bf16.msra.mxu1 %v2423_v53 }
  0xaf   : > { %2111 = vmatpush3.bf16.msra.mxu0 %v2424_v54  ;;  %1189 = vmatprep.subr.bf16.mxu1 %v2431_v39 }
  0xb0   : > { %2177 = vmatprep.subr.bf16.mxu0 %v2693_v13 }
 0x120   : > { %v592_v14 = vpop.xlane.xlu0 %591 }
 0x121   : > { %v598_v15 = vmul.f32 0.0026041667, %v592_v14 }
 0x123   : > { %v3001_v16 = vsub.f32 %v583_v0, %v598_v15  ;;  %v3003_v17 = vsub.f32 %v584_v1, %v598_v15  ;;  %v3005_v18 = vsub.f32 %v585_v2, %v598_v15  ;;  %v644_v0 = vsub.s32 2, %v635_v62  ;;  %v632_v1 = vld [vmem:[%s3377_s2] sm:$0x7] }
 0x124   : > { %v596_v19 = vpop.xlane.xlu0 %595  ;;  %v636_v2 = vsub.s32 0, %v635_v62 }
 0x125   : > { %v599_v20 = vmul.f32 0.0026041667, %v596_v19  ;;  %v606_v21 = vmul.f32 %v3001_v16, %v3001_v16  ;;  %v607_v22 = vmul.f32 %v3003_v17, %v3003_v17  ;;  %v608_v23 = vmul.f32 %v3005_v18, %v3005_v18 }
 0x126   : > { %v645_v8 = vrot.slane %v632_v1, %v644_v0  ;;  %v637_v10 = vrot.slane %v632_v1, %v636_v2 }
 0x127   : > { %v3013_v24 = vsub.f32 %v586_v4, %v599_v20  ;;  %v3015_v25 = vsub.f32 %v587_v5, %v599_v20  ;;  %v3017_v26 = vsub.f32 %v588_v6, %v599_v20  ;;  %v612_v27 = vadd.f32 %v607_v22, %v606_v21  ;;  %v655_v6 = vld [vmem:[%s3378_s3] sm:$0x7] }
 0x128   : > { %v641_v5 = vrot.slane %v632_v1, %v640_v63  ;;  %v664_v12 = vrot.slane %v655_v6, %v640_v63  ;;  %v668_v14 = vrot.slane %v655_v6, %v644_v0 }
 0x129   : > { %v613_v28 = vadd.f32 %v612_v27, %v608_v23  ;;  %v609_v29 = vmul.f32 %v3013_v24, %v3013_v24  ;;  %v610_v30 = vmul.f32 %v3015_v25, %v3015_v25  ;;  %v611_v31 = vmul.f32 %v3017_v26, %v3017_v26 }
 0x12a   : > { %v660_v23 = vrot.slane %v655_v6, %v636_v2  ;;  %v2432_v6 = vld [vmem:[%s3383_s8 + $0x8] ss:$20 sps:$4 sm:$0xff]  }
 0x12b   : > { %614 = vadd.xlane.f32.xlu1 %v613_v28  ;;  %v616_v32 = vadd.f32 %v610_v30, %v609_v29 }
 0x12d   : > { %v617_v33 = vadd.f32 %v616_v32, %v611_v31 }
 0x12f   : > { %618 = vadd.xlane.f32.xlu1 %v617_v33 }
 0x1b8   : > { %v615_v55 = vpop.xlane.xlu1 %614 }
 0x1b9   : > { %v620_v56 = vmul.f32 0.0026041667, %v615_v55 }
 0x1bb   : > { %v622_v57 = vadd.f32 1e-05, %v620_v56 }
 0x1bc   : > { %v619_v58 = vpop.xlane.xlu1 %618 }
 0x1bd   : > { %2469 = vrsqrt.f32 %v622_v57  ;;  %v621_v60 = vmul.f32 0.0026041667, %v619_v58 }
 0x1bf   : > { %v623_v61 = vadd.f32 1e-05, %v621_v60 }
 0x1c1   : > { %2471 = vrsqrt.f32 %v623_v61 }
 0x1c7   : > { %v2470_v3 = vpop.eup %2469 }
 0x1c8   : > { %v627_v4 = vmul.f32 %v2470_v3, %v3003_v17  ;;  %v628_v7 = vmul.f32 %v2470_v3, %v3005_v18  ;;  %v626_v9 = vmul.f32 %v2470_v3, %v3001_v16 }
 0x1ca   : > { %v650_v19 = vmul.f32 %v641_v5, %v627_v4  ;;  %v651_v17 = vmul.f32 %v645_v8, %v628_v7  ;;  %v649_v22 = vmul.f32 %v637_v10, %v626_v9  ;;  %v2438_v9 = vld [vmem:[%s3383_s8 + $0x30] ss:$20 sps:$4 sm:$0xff]  }
 0x1cb   : > { %v2472_v11 = vpop.eup %2471 }
 0x1cc   : > { %v630_v15 = vmul.f32 %v2472_v11, %v3015_v25  ;;  %v631_v20 = vmul.f32 %v2472_v11, %v3017_v26  ;;  %v629_v21 = vmul.f32 %v2472_v11, %v3013_v24  ;;  %v673_v29 = vadd.f32 %v664_v12, %v650_v19  ;;  %v2425_v24 = vld [vmem:[%s3381_s6] sm:$0xff]   ;;  %v2426_v26 = vld [vmem:[%s3381_s6 + $0x8] sm:$0xff]  }
 0x1cd   : > { %v674_v16 = vadd.f32 %v668_v14, %v651_v17  ;;  %v672_v32 = vadd.f32 %v660_v23, %v649_v22  ;;  %v2444_v11 = vld [vmem:[%s3383_s8 + $0x58] ss:$20 sps:$4 sm:$0xff]   ;;  %v2450_v19 = vld [vmem:[%s3383_s8 + $0x80] ss:$20 sps:$4 sm:$0xff]  }
 0x1ce   : > { %v653_v27 = vmul.f32 %v641_v5, %v630_v15  ;;  %v654_v28 = vmul.f32 %v645_v8, %v631_v20  ;;  %v652_v18 = vmul.f32 %v637_v10, %v629_v21  ;;  %v2440_v8 = vld [vmem:[%s3383_s8 + $0x34] ss:$20 sps:$4 sm:$0xff]   ;;  %v2446_v10 = vld [vmem:[%s3383_s8 + $0x5c] ss:$20 sps:$4 sm:$0xff]   ;;  %v2452_v15 = vld [vmem:[%s3383_s8 + $0x84] ss:$20 sps:$4 sm:$0xff]  }
 0x1cf   : > { %v2695_v20 = vmov 0   ;;  %v2035_v17 = vld [vmem:[%s3422_s29] ss:$0 sm:$0xff]  ;;  %s573_s29 = scalar_lea.vmem [#allocation10], %s2007_s7 }
 0x1d0   : > { %v676_v30 = vadd.f32 %v664_v12, %v653_v27  ;;  %v677_v31 = vadd.f32 %v668_v14, %v654_v28  ;;  %v675_v33 = vadd.f32 %v660_v23, %v652_v18  ;;  %v2449_v12 = vld [vmem:[%s3383_s8 + $0x7c] ss:$20 sps:$4 sm:$0xff]   ;;  %v2447_v14 = vld [vmem:[%s3383_s8 + $0x78] ss:$20 sps:$4 sm:$0xff]   ;;  %s1880_s26 = sshll.u32 %s573_s29, 4  ;;  %s3328_s26 = int_to_ptr.vmem [resolvable:$true] %s1880_s26 }
 0x1d1   : > { %s2607_s23 = scalar_lea.vmem %s3328_s26, 1024 }
 0x1d2   : > { %v679_v34 = vpack.c.bf16 %v676_v30, %v673_v29  ;;  %v680_v35 = vpack.c.bf16 %v677_v31, %v674_v16  ;;  %v678_v25 = vpack.c.bf16 %v675_v33, %v672_v32  ;;  %v2453_v29 = vld [vmem:[%s3383_s8 + $0x10] ss:$20 sps:$4 sm:$0xff]   ;;  %v2454_v16 = vld [vmem:[%s3383_s8 + $0x38] ss:$20 sps:$4 sm:$0xff]   ;;  %v2455_v31 = vld [vmem:[%s3383_s8 + $0x60] ss:$20 sps:$4 sm:$0xff]   ;;  %p2608_p3 = scmp.ne.s32.totalorder %s3328_s26, %s2607_s23 }
 0x1d3   : > { %v2456_v32 = vld [vmem:[%s3383_s8 + $0x88] ss:$20 sps:$4 sm:$0xff]   ;;  %v2696_v33 = vmov 0.0|0.0  }
 0x1d4   : > { %912 = vmatprep.mubr.bf16.mxu0 %v679_v34  ;;  %2174 = vmatmul.mubr.bf16.vlgmr.msra.gmra.mrb[0].mxu1 %v680_v35  ;;  %p2609_p7 = pnand %p2608_p3, %p2926_p5 }
 0x1d5   : > { %913 = vmatmul.mubr.bf16.vlgmr.msra.gmra.mrb[0].mxu0 %v678_v25  ;;  %1190 = vmatpush1.bf16.msra.mxu1 %v2429_v38 }
 0x1d6   : > { %2185 = vmatprep.mubr.msk.bf16.mxu0 %vm2694_vm0, %v2693_v13  ;;  %2178 = vmatpush3.bf16.msra.mxu0 %v2425_v24  ;;  %p2610_p12 = pneg %p2609_p7 }
 0x1d7   : > { %2179 = vmatprep.subr.bf16.mxu0 %v2693_v13  ;;  %1191 = vmatprep.subr.bf16.mxu1 %v2437_v41 }
 0x1d8   : > { %1221 = vmatprep.mubr.bf16.mxu1 %v2695_v20 }
 0x1d9   : > { %1192 = vmatpush1.bf16.msra.mxu1 %v2435_v42 }
 0x1da   : > { %2180 = vmatpush3.bf16.msra.mxu0 %v2426_v26  ;;  %1193 = vmatprep.subr.bf16.mxu1 %v2443_v43 }
 0x1db   : > { %2181 = vmatprep.subr.bf16.mxu0 %v2693_v13 }
 0x1dd   : > { %1194 = vmatpush1.bf16.msra.mxu1 %v2441_v44 }
 0x1de   : > { %2182 = vmatpush3.bf16.msra.mxu0 %v2427_v36  ;;  %1195 = vmatprep.subr.bf16.mxu1 %v2449_v12 }
 0x1df   : > { %2183 = vmatprep.subr.bf16.mxu0 %v2693_v13 }
 0x1e1   : > { %1196 = vmatpush1.bf16.msra.mxu1 %v2447_v14 }
 0x1e2   : > { %2184 = vmatpush3.bf16.msra.mxu0 %v2428_v37  ;;  %2189 = vmatprep.subr.bf16.mxu1 %v2693_v13 }
 0x1e3   : > { %1232 = vmatprep.subr.bf16.mxu0 %v2434_v40 }
 0x2a7   : > { %v955_v45 = vpop.f32.mrb[0].mxu1 }
 0x2a8   : > { %v2112_v46 = vpop.f32.mrb[0].mxu0  ;;  %v2175_v47 = vpop.f32.mrb[1].mxu1 }
 0x2a9   : > { %v2113_v49 = vpop.f32.mrb[1].mxu0  ;;  %v958_v50 = vpop.f32.mrb[2].mxu1 }
 0x2aa   : > { %v2114_v51 = vadd.f32 %v2113_v49, %v2112_v46  ;;  %v2115_v52 = vpop.f32.mrb[2].mxu0  ;;  %v2176_v53 = vpop.f32.mrb[3].mxu1 }
 0x2ab   : > { %v2116_v54 = vpop.f32.mrb[3].mxu0  ;;  %v2457_v53 = vld [vmem:[%s3423_s17] sm:$0xff]  }
 0x2ac   : > { %v915_v55 = vadd.f32 %v2114_v51, %v2010_v48  ;;  %v2117_v56 = vadd.f32 %v2116_v54, %v2115_v52  ;;  %v3238_v51 = vld [vmem:[#allocation5] sm:$0xff]  ;;  %v2458_v54 = vld [vmem:[%s3423_s17 + $0x8] sm:$0xff]  }
 0x2ad   : > { %v1357_v52 = vunpack.c.h.bf16 %v3238_v51 }
 0x2ae   : > { %v956_v57 = vadd.f32 %v955_v45, %v915_v55  ;;  %v918_v58 = vadd.f32 %v2117_v56, %v2010_v48  ;;  %v2459_v55 = vld [vmem:[%s3423_s17 + $0x10] sm:$0xff]   ;;  %v2460_v56 = vld [vmem:[%s3423_s17 + $0x18] sm:$0xff]  }
 0x2b0   : > { %v964_v59 = vmul.f32 0.70710677, %v956_v57  ;;  %v959_v60 = vadd.f32 %v958_v50, %v918_v58  ;;  %v962_v1 = vmul.f32 0.5, %v956_v57  ;;  %v1510_v57 = vld [vmem:[%s579_s16] sm:$0xff]  ;;  %v1511_v58 = vld [vmem:[%s579_s16 + $0x8] sm:$0xff] }
 0x2b2   : > { %2473 = verf.f32 %v964_v59  ;;  %v965_v61 = vmul.f32 0.70710677, %v959_v60  ;;  %v963_v2 = vmul.f32 0.5, %v959_v60  ;;  %v1512_v59 = vld [vmem:[%s579_s16 + $0x10] sm:$0xff]  ;;  %v2381_v60 = vpack.i.bf16 %v1511_v58, %v1510_v57 }
 0x2b4   : > { %2475 = verf.f32 %v965_v61  ;;  %v1513_v61 = vld [vmem:[%s579_s16 + $0x18] sm:$0xff] }
 0x2bc   : > { %v2474_v62 = vpop.eup %2473 }
 0x2bd   : > { %v968_v63 = vadd.f32 1.0, %v2474_v62  ;;  %v1514_v62 = vld [vmem:[%s579_s16 + $0x20] sm:$0xff] }
 0x2be   : > { %v2476_v0 = vpop.eup %2475 }
 0x2bf   : > { %v969_v3 = vadd.f32 1.0, %v2476_v0  ;;  %v970_v4 = vmul.f32 %v968_v63, %v962_v1  ;;  %v1515_v63 = vld [vmem:[%s579_s16 + $0x28] sm:$0xff]  ;;  %v2386_v0 = vpack.i.bf16 %v1513_v61, %v1512_v59  ;;  %v1516_v1 = vld [vmem:[%s579_s16 + $0x30] sm:$0xff] }
 0x2c0   : > { %v1374_v61 = vld [vmem:[#allocation7 + $0x10] sm:$0xff] }
 0x2c1   : > { %v971_v5 = vmul.f32 %v969_v3, %v963_v2  ;;  %v1517_v2 = vld [vmem:[%s579_s16 + $0x38] sm:$0xff]  ;;  %v2391_v3 = vpack.i.bf16 %v1515_v63, %v1514_v62  ;;  %s3425_s16 = sld [smem:[#allocation21_spill]] }
 0x2c3   : > { %v972_v7 = vpack.c.bf16 %v971_v5, %v970_v4  ;;  %v2396_v4 = vpack.i.bf16 %v1517_v2, %v1516_v1  ;;  %v1375_v1 = vld [vmem:[#allocation7 + $0x18] sm:$0xff] }
 0x2c5   : > { %2186 = vmatmul.mubr.msk.bf16.vlgmr.msra.gmra.mrb[4].mxu0 %vm1012_vm1, %v972_v7 }
 0x2c6   : > { %1233 = vmatpush1.bf16.msra.mxu0 %v2432_v6  ;;  %1264 = vmatprep.mubr.bf16.mxu0 %v2695_v20 }
 0x2c7   : > { %1234 = vmatprep.subr.bf16.mxu0 %v2440_v8 }
 0x2ca   : > { %1235 = vmatpush1.bf16.msra.mxu0 %v2438_v9 }
 0x2cb   : > { %1236 = vmatprep.subr.bf16.mxu0 %v2446_v10 }
 0x2ce   : > { %1237 = vmatpush1.bf16.msra.mxu0 %v2444_v11 }
 0x2cf   : > { %1238 = vmatprep.subr.bf16.mxu0 %v2452_v15 }
 0x2d2   : > { %1239 = vmatpush1.bf16.msra.mxu0 %v2450_v19 }
 0x2d3   : > { %2241 = vmatprep.subr.bf16.mxu0 %v2696_v33 }
 0x398   : > { %v1050_v21 = vpop.f32.mrb[4].mxu0 }
 0x399   : > { %v2187_v22 = vpop.f32.mrb[5].mxu0  ;;  %v1051_v27 = vadd.f32 %v2035_v17, %v1050_v21 }
 0x39a   : > { %v1053_v23 = vpop.f32.mrb[6].mxu0 }
 0x39b   : > { %v1054_v28 = vadd.f32 %v2035_v17, %v1053_v23  ;;  %v2188_v18 = vpop.f32.mrb[7].mxu0 }
 0x39d   : > { %v1057_v30 = vpack.c.bf16 %v1054_v28, %v1051_v27  ;;  %v1349_v27 = vld [vmem:[#allocation5 + $0x8] sm:$0xff]  ;;  %v1356_v28 = vunpack.c.l.bf16 %v3238_v51 }
 0x39e   : > { %v1359_v18 = vunpack.c.h.bf16 %v1349_v27  ;;  %v1373_v51 = vld [vmem:[#allocation7 + $0x8] sm:$0xff] }
 0x39f   : > { %2061 = vmatmul.mubr.msk.bf16.vlgmr.msra.gmra.mrb[4].mxu1 %vm1012_vm1, %v1057_v30  ;;  %2062 = vmatmul.mubr.msk.bf16.vlgmr.msra.gmra.mrb[8].mxu0 %vm1012_vm1, %v1057_v30 }
 0x3a0   : > { %2190 = vmatpush3.bf16.msra.mxu1 %v2453_v29  ;;  %2197 = vmatprep.mubr.msk.bf16.mxu1 %vm2694_vm0, %v2693_v13  ;;  %v1350_v29 = vld [vmem:[#allocation5 + $0x10] sm:$0xff] }
 0x3a1   : > { %2191 = vmatprep.subr.bf16.mxu1 %v2693_v13  ;;  %2064 = vmatprep.mubr.msk.f32.mxu0 %vm1380_vm2, %v1357_v52 }
 0x3a4   : > { %2192 = vmatpush3.bf16.msra.mxu1 %v2454_v16  ;;  %v1361_v16 = vunpack.c.h.bf16 %v1350_v29 }
 0x3a5   : > { %2193 = vmatprep.subr.bf16.mxu1 %v2693_v13 }
 0x3a8   : > { %2194 = vmatpush3.bf16.msra.mxu1 %v2455_v31  ;;  %v1351_v31 = vld [vmem:[#allocation5 + $0x18] sm:$0xff] }
 0x3a9   : > { %2195 = vmatprep.subr.bf16.mxu1 %v2693_v13 }
 0x3ac   : > { %2196 = vmatpush3.bf16.msra.mxu1 %v2456_v32  ;;  %v1360_v32 = vunpack.c.l.bf16 %v1350_v29 }
 0x3ad   : > { %2201 = vmatprep.subr.bf16.mxu1 %v2457_v53 }
 0x3af   : > { %2198 = vmatmul.mubr.msk.bf16.vlgmr.msra.gmra.mrb[8].mxu1 %vm1012_vm1, %v1057_v30  ;;  %v1358_v30 = vunpack.c.l.bf16 %v1349_v27 }
 0x3b0   : > { %2202 = vmatpush3.bf16.msra.mxu1 %v2457_v53 }
 0x3b1   : > { %2203 = vmatprep.subr.bf16.mxu1 %v2458_v54 }
 0x3b4   : > { %2204 = vmatpush3.bf16.msra.mxu1 %v2458_v54 }
 0x3b5   : > { %2205 = vmatprep.subr.bf16.mxu1 %v2459_v55 }
 0x3b8   : > { %2206 = vmatpush3.bf16.msra.mxu1 %v2459_v55 }
 0x3b9   : > { %2207 = vmatprep.subr.bf16.mxu1 %v2460_v56 }
 0x3bc   : > { %2208 = vmatpush3.bf16.msra.mxu1 %v2460_v56 }
 0x472   : > { %v1223_v34 = vpop.f32.mrb[4].mxu1  ;;  %v3203_v35 = vpop.f32.mrb[8].mxu0 }
 0x473   : > { %v3205_v25 = vpop.f32.mrb[5].mxu1  ;;  %v3207_v24 = vpop.f32.mrb[9].mxu0 }
 0x474   : > { %v1227_v26 = vpop.f32.mrb[6].mxu1  ;;  %v3209_v36 = vpop.f32.mrb[10].mxu0 }
 0x475   : > { %v2361_v37 = vpack.i.bf16 %v1227_v26, %v1223_v34  ;;  %v2242_v38 = vpack.c.bf16 %v1227_v26, %v1223_v34  ;;  %v2371_v13 = vpack.i.bf16 %v3209_v36, %v3203_v35  ;;  %v2254_v39 = vpack.c.bf16 %v3209_v36, %v3203_v35  ;;  %v3215_v40 = vpop.f32.mrb[7].mxu1  ;;  %v3217_v41 = vpop.f32.mrb[11].mxu0  ;;  %v1352_v34 = vld [vmem:[#allocation5 + $0x20] sm:$0xff] }
 0x476   : > { %v2366_v42 = vpack.i.bf16 %v3215_v40, %v3205_v25  ;;  %v2248_v43 = vpack.c.bf16 %v3215_v40, %v3205_v25  ;;  %v2376_v44 = vpack.i.bf16 %v3217_v41, %v3207_v24  ;;  %v2260_v45 = vpack.c.bf16 %v3217_v41, %v3207_v24  ;;  %v1353_v24 = vld [vmem:[#allocation5 + $0x28] sm:$0xff] }
 0x477   : > { %2362 = vrot.lane.b32.xlu0 %v2361_v37, %s2697_s5  ;;  %2243 = vmatpush1.bf16.msra.mxu0 %v2242_v38  ;;  %v1362_v35 = vunpack.c.l.bf16 %v1351_v31  ;;  %v1365_v25 = vunpack.c.h.bf16 %v1352_v34  ;;  %v1364_v26 = vunpack.c.l.bf16 %v1352_v34  ;;  %v1367_v36 = vunpack.c.h.bf16 %v1353_v24  ;;  %v1354_v37 = vld [vmem:[#allocation5 + $0x30] sm:$0xff] }
 0x478   : > { %2367 = vrot.lane.b32.xlu1 %v2366_v42, %s2697_s5  ;;  %2244 = vmatprep.subr.bf16.mxu0 %v2696_v33  ;;  %v1366_v38 = vunpack.c.l.bf16 %v1353_v24  ;;  %v1368_v40 = vunpack.c.l.bf16 %v1354_v37 }
 0x47b   : > { %2382 = vrot.lane.b32.xlu0 %v2381_v60, %s2697_s5 }
 0x47c   : > { %2372 = vrot.lane.b32.xlu1 %v2371_v13, %s2697_s5  ;;  %v1369_v13 = vunpack.c.h.bf16 %v1354_v37 }
 0x47f   : > { %2392 = vrot.lane.b32.xlu0 %v2391_v3, %s2697_s5 }
 0x480   : > { %2377 = vrot.lane.b32.xlu1 %v2376_v44, %s2697_s5  ;;  %v2462_v44 = vld [vmem:[%s3423_s17 + $0x28] sm:$0xff]  }
 0x482   : > { %v3232_v46 = vpop.f32.mrb[8].mxu1 }
 0x483   : > { %v2199_v47 = vpop.f32.mrb[9].mxu1 }
 0x484   : > { %v3234_v48 = vpop.f32.mrb[10].mxu1  ;;  %2387 = vrot.lane.b32.xlu1 %v2386_v0, %s2697_s5 }
 0x485   : > { %v2266_v49 = vpack.c.bf16 %v3234_v48, %v3232_v46  ;;  %v2200_v50 = vpop.f32.mrb[11].mxu1  ;;  %v2464_v46 = vld [vmem:[%s3423_s17 + $0x38] sm:$0xff]   ;;  %v1372_v48 = vld [vmem:[#allocation7] sm:$0xff] }
 0x488   : > { %2397 = vrot.lane.b32.xlu1 %v2396_v4, %s2697_s5 }
 0x4e9   : > { %v2363_v5 = vpop.permute.xlu0 %2362 }
 0x4ea   : > { %v2365_v6 = vunpack.i.h.bf16 %v2363_v5  ;;  %v2364_v7 = vunpack.i.l.bf16 %v2363_v5  ;;  %v2368_v9 = vpop.permute.xlu1 %2367 }
 0x4eb   : > { %v2370_v10 = vunpack.i.h.bf16 %v2368_v9  ;;  %v2369_v11 = vunpack.i.l.bf16 %v2368_v9 }
 0x4ec   : > { %v2245_v8 = vpack.c.bf16 %v2365_v6, %v2364_v7 }
 0x4ed   : > { %v2251_v12 = vpack.c.bf16 %v2370_v10, %v2369_v11  ;;  %v2383_v47 = vpop.permute.xlu0 %2382 }
 0x4ee   : > { %2246 = vmatpush1.bf16.msra.mxu0 %v2245_v8  ;;  %v2373_v14 = vpop.permute.xlu1 %2372  ;;  %v2385_v52 = vunpack.i.h.bf16 %v2383_v47  ;;  %v2384_v53 = vunpack.i.l.bf16 %v2383_v47 }
 0x4ef   : > { %2247 = vmatprep.subr.bf16.mxu0 %v2696_v33  ;;  %v2375_v15 = vunpack.i.h.bf16 %v2373_v14  ;;  %v2374_v19 = vunpack.i.l.bf16 %v2373_v14 }
 0x4f1   : > { %v2257_v20 = vpack.c.bf16 %v2375_v15, %v2374_v19  ;;  %v2393_v11 = vpop.permute.xlu0 %2392  ;;  %v1377_v19 = vld [vmem:[#allocation7 + $0x28] sm:$0xff] }
 0x4f2   : > { %2249 = vmatpush1.bf16.msra.mxu0 %v2248_v43  ;;  %v2378_v17 = vpop.permute.xlu1 %2377  ;;  %v2461_v43 = vld [vmem:[%s3423_s17 + $0x20] sm:$0xff]  }
 0x4f3   : > { %2250 = vmatprep.subr.bf16.mxu0 %v2696_v33  ;;  %v2380_v21 = vunpack.i.h.bf16 %v2378_v17  ;;  %v2379_v22 = vunpack.i.l.bf16 %v2378_v17  ;;  %2209 = vmatprep.subr.bf16.mxu1 %v2461_v43  ;;  %v2394_v17 = vunpack.i.l.bf16 %v2393_v11 }
 0x4f4   : > { %2210 = vmatpush3.bf16.msra.mxu1 %v2461_v43  ;;  %v2072_v43 = vld [vmem:[%s3425_s16] ss:$0 sm:$0xff]  ;;  %s2698_s16 = smov [#allocation10]  }
 0x4f5   : > { %v2263_v23 = vpack.c.bf16 %v2380_v21, %v2379_v22  ;;  %2211 = vmatprep.subr.bf16.mxu1 %v2462_v44  ;;  %s2611_s7 = sshll.u32 %s2698_s16, 4  ;;  %s2612_s7 = int_to_ptr.vmem [resolvable:$false] %s2611_s7 }
 0x4f6   : > { %2252 = vmatpush1.bf16.msra.mxu0 %v2251_v12  ;;  %v2388_v60 = vpop.permute.xlu1 %2387  ;;  %v1376_v12 = vld [vmem:[#allocation7 + $0x20] sm:$0xff]  ;;  %s2613_s30 = scalar_lea.vmem %s2612_s7, 2048  ;;  %p2614_p2 = scmp.lt.s32.totalorder %s3328_s26, %s2612_s7 }
 0x4f7   : > { %2253 = vmatprep.subr.bf16.mxu0 %v2696_v33  ;;  %v2390_v2 = vunpack.i.h.bf16 %v2388_v60  ;;  %v2389_v3 = vunpack.i.l.bf16 %v2388_v60  ;;  %p2615_p1 = scmp.lt.s32.totalorder %s2613_s30, %s2607_s23 }
 0x4f8   : > { %2212 = vmatpush3.bf16.msra.mxu1 %v2462_v44 }
 0x4f9   : > { %p2616_p4 = por %p2615_p1, %p2614_p2 }
 0x4fa   : > { %2255 = vmatpush1.bf16.msra.mxu0 %v2254_v39  ;;  %v1355_v39 = vld [vmem:[#allocation5 + $0x38] sm:$0xff]  ;;  %v2398_v29 = vpop.permute.xlu1 %2397 }
 0x4fb   : > { %2256 = vmatprep.subr.bf16.mxu0 %v2696_v33  ;;  %v1371_v41 = vunpack.c.h.bf16 %v1355_v39  ;;  %v1370_v42 = vunpack.c.l.bf16 %v1355_v39  ;;  %v2400_v34 = vunpack.i.h.bf16 %v2398_v29  ;;  %v2465_v39 = vld [vmem:[#allocation8] sm:$0xff]   ;;  %p2617_p9 = pnand %p2616_p4, %p2610_p12 }
 0x4fe   : > { %2258 = vmatpush1.bf16.msra.mxu0 %v2257_v20  ;;  %v2395_v20 = vunpack.i.h.bf16 %v2393_v11 }
 0x4ff   : > { %2259 = vmatprep.subr.bf16.mxu0 %v2696_v33 }
 0x502   : > { %2261 = vmatpush1.bf16.msra.mxu0 %v2260_v45  ;;  %v2463_v45 = vld [vmem:[%s3423_s17 + $0x30] sm:$0xff]  }
 0x503   : > { %2262 = vmatprep.subr.bf16.mxu0 %v2696_v33  ;;  %2213 = vmatprep.subr.bf16.mxu1 %v2463_v45 }
 0x504   : > { %2214 = vmatpush3.bf16.msra.mxu1 %v2463_v45 }
 0x505   : > { %2215 = vmatprep.subr.bf16.mxu1 %v2464_v46 }
 0x506   : > { %2264 = vmatpush1.bf16.msra.mxu0 %v2263_v23 }
 0x507   : > { %2265 = vmatprep.subr.bf16.mxu0 %v2696_v33  ;;  %v1363_v33 = vunpack.c.h.bf16 %v1351_v31 }
 0x508   : > { %2216 = vmatpush3.bf16.msra.mxu1 %v2464_v46 }
 0x509   : > { %2225 = vmatprep.subr.bf16.mxu1 %v2465_v39 }
 0x50a   : > { %2267 = vmatpush1.bf16.msra.mxu0 %v2266_v49 }
 0x50d   : > { %1470 = vmatmul.mubr.f32.vlgmr.msra.gmra.mrb[12].mxu0 %v1356_v28 }
 0x50e   : > { %2065 = vmatprep.mubr.msk.f32.mxu0 %vm1380_vm2, %v1359_v18 }
 0x511   : > { %1475 = vmatmul.mubr.f32.gmra.mrb[14].mxu0 %v1358_v30  ;;  %v1378_v30 = vld [vmem:[#allocation7 + $0x30] sm:$0xff] }
 0x512   : > { %2066 = vmatprep.mubr.msk.f32.mxu0 %vm1380_vm2, %v1361_v16 }
 0x515   : > { %1480 = vmatmul.mubr.f32.gmra.mrb[16].mxu0 %v1360_v32 }
 0x516   : > { %2067 = vmatprep.mubr.msk.f32.mxu0 %vm1380_vm2, %v1363_v33  ;;  %v1379_v33 = vld [vmem:[#allocation7 + $0x38] sm:$0xff] }
 0x519   : > { %1485 = vmatmul.mubr.f32.gmra.mrb[18].mxu0 %v1362_v35  ;;  %v2399_v35 = vunpack.i.l.bf16 %v2398_v29 }
 0x51a   : > { %2068 = vmatprep.mubr.msk.f32.mxu0 %vm1380_vm2, %v1365_v25 }
 0x51d   : > { %1490 = vmatmul.mubr.f32.gmra.mrb[20].mxu0 %v1364_v26 }
 0x51e   : > { %2069 = vmatprep.mubr.msk.f32.mxu0 %vm1380_vm2, %v1367_v36 }
 0x521   : > { %1495 = vmatmul.mubr.f32.gmra.mrb[22].mxu0 %v1366_v38 }
 0x522   : > { %2070 = vmatprep.mubr.msk.f32.mxu0 %vm1380_vm2, %v1369_v13 }
 0x525   : > { %1500 = vmatmul.mubr.f32.gmra.mrb[24].mxu0 %v1368_v40  ;;  %v2466_v40 = vld [vmem:[#allocation8 + $0x8] sm:$0xff]  }
 0x526   : > { %2071 = vmatprep.mubr.msk.f32.mxu0 %vm1380_vm2, %v1371_v41  ;;  %v2467_v41 = vld [vmem:[#allocation8 + $0x10] sm:$0xff]  }
 0x529   : > { %1505 = vmatmul.mubr.f32.gmra.mrb[26].mxu0 %v1370_v42  ;;  %v2468_v42 = vld [vmem:[#allocation8 + $0x18] sm:$0xff]  }
 0x5e0   : > { %v1471_v49 = vpop.f32.mrb[12].mxu0 }
 0x5e1   : > { %v1473_v50 = vpop.f32.mrb[13].mxu0  ;;  %v1472_v54 = vadd.f32 %v1471_v49, %v1372_v48 }
 0x5e3   : > { %v1550_v58 = vsel %vm1012_vm1, %v1472_v54, %v2384_v53 }
 0x5e4   : > { %v1476_v55 = vpop.f32.mrb[14].mxu0 }
 0x5e5   : > { %v1477_v56 = vadd.f32 %v1476_v55, %v1373_v51  ;;  %v1478_v57 = vpop.f32.mrb[15].mxu0 }
 0x5e7   : > { %v1551_v59 = vsel %vm1012_vm1, %v1477_v56, %v2385_v52 }
 0x5e8   : > { %v1481_v62 = vpop.f32.mrb[16].mxu0  ;;  %v1558_v63 = vpack.c.bf16 %v1551_v59, %v1550_v58 }
 0x5e9   : > { %v1483_v0 = vpop.f32.mrb[17].mxu0  ;;  %v1482_v4 = vadd.f32 %v1481_v62, %v1374_v61 }
 0x5ea   : > { %2217 = vmatprep.mubr.bf16.mxu1 %v1558_v63 }
 0x5eb   : > { %v1552_v8 = vsel %vm1012_vm1, %v1482_v4, %v2389_v3 }
 0x5ec   : > { %v1486_v5 = vpop.f32.mrb[18].mxu0 }
 0x5ed   : > { %v1487_v6 = vadd.f32 %v1486_v5, %v1375_v1  ;;  %v1488_v7 = vpop.f32.mrb[19].mxu0 }
 0x5ef   : > { %v1553_v9 = vsel %vm1012_vm1, %v1487_v6, %v2390_v2 }
 0x5f0   : > { %v1559_v10 = vpack.c.bf16 %v1553_v9, %v1552_v8  ;;  %v1491_v14 = vpop.f32.mrb[20].mxu0 }
 0x5f1   : > { %v1493_v15 = vpop.f32.mrb[21].mxu0  ;;  %v1492_v21 = vadd.f32 %v1491_v14, %v1376_v12 }
 0x5f2   : > { %2218 = vmatmul.mubr.bf16.vlgmr.msra.gmra.mrb[12].mxu1 %v1559_v10 }
 0x5f3   : > { %v1554_v28 = vsel %vm1012_vm1, %v1492_v21, %v2394_v17  ;;  %2226 = vmatpush3.bf16.msra.mxu1 %v2465_v39 }
 0x5f4   : > { %v1496_v22 = vpop.f32.mrb[22].mxu0  ;;  %2227 = vmatprep.subr.bf16.mxu1 %v2466_v40 }
 0x5f5   : > { %v1497_v23 = vadd.f32 %v1496_v22, %v1377_v19  ;;  %v1498_v27 = vpop.f32.mrb[23].mxu0 }
 0x5f7   : > { %v1555_v18 = vsel %vm1012_vm1, %v1497_v23, %v2395_v20  ;;  %2228 = vmatpush3.bf16.msra.mxu1 %v2466_v40  ;;  %v2081_v40 = vld [vmem:[%s3426_s18] ss:$0 sm:$0xff] }
 0x5f8   : > { %v1501_v16 = vpop.f32.mrb[24].mxu0  ;;  %v1560_v31 = vpack.c.bf16 %v1555_v18, %v1554_v28  ;;  %2229 = vmatprep.subr.bf16.mxu1 %v2467_v41 }
 0x5f9   : > { %v1503_v32 = vpop.f32.mrb[25].mxu0  ;;  %v1502_v25 = vadd.f32 %v1501_v16, %v1378_v30 }
 0x5fa   : > { %2221 = vmatprep.mubr.bf16.mxu1 %v1560_v31 }
 0x5fb   : > { %v1556_v37 = vsel %vm1012_vm1, %v1502_v25, %v2399_v35  ;;  %2230 = vmatpush3.bf16.msra.mxu1 %v2467_v41 }
 0x5fc   : > { %v1506_v24 = vpop.f32.mrb[26].mxu0  ;;  %2231 = vmatprep.subr.bf16.mxu1 %v2468_v42 }
 0x5fd   : > { %v1507_v26 = vadd.f32 %v1506_v24, %v1379_v33  ;;  %v1508_v36 = vpop.f32.mrb[27].mxu0 }
 0x5ff   : > { %v1557_v38 = vsel %vm1012_vm1, %v1507_v26, %v2400_v34  ;;  %2232 = vmatpush3.bf16.msra.mxu1 %v2468_v42 }
 0x600   : > { %v1561_v13 = vpack.c.bf16 %v1557_v38, %v1556_v37 }
 0x602   : > { %2222 = vmatmul.mubr.bf16.gmra.mrb[16].mxu1 %v1561_v13 }
 0x6c5   : > { %v2219_v44 = vpop.f32.mrb[12].mxu1 }
 0x6c6   : > { %v1676_v45 = vadd.f32 %v2219_v44, %v2072_v43  ;;  %v1667_v46 = vpop.f32.mrb[13].mxu1 }
 0x6c7   : > { %v1668_v47 = vadd.f32 %v2072_v43, %v1667_v46  ;;  %v2220_v48 = vpop.f32.mrb[14].mxu1 }
 0x6c8   : > { %v1708_v49 = vmul.f32 0.70710677, %v1676_v45  ;;  %v1679_v50 = vadd.f32 %v2220_v48, %v2072_v43  ;;  %v1670_v51 = vpop.f32.mrb[15].mxu1  ;;  %v1700_v1 = vmul.f32 0.5, %v1676_v45 }
 0x6c9   : > { %v1706_v52 = vmul.f32 0.70710677, %v1668_v47  ;;  %v1671_v53 = vadd.f32 %v2072_v43, %v1670_v51  ;;  %v1698_v6 = vmul.f32 0.5, %v1668_v47 }
 0x6ca   : > { %2477 = verf.f32 %v1708_v49  ;;  %v1709_v54 = vmul.f32 0.70710677, %v1679_v50  ;;  %v1701_v2 = vmul.f32 0.5, %v1679_v50 }
 0x6cb   : > { %2479 = verf.f32 %v1706_v52  ;;  %v1707_v55 = vmul.f32 0.70710677, %v1671_v53  ;;  %v1699_v7 = vmul.f32 0.5, %v1671_v53 }
 0x6cc   : > { %2481 = verf.f32 %v1709_v54 }
 0x6cd   : > { %2483 = verf.f32 %v1707_v55 }
 0x6d4   : > { %v2478_v56 = vpop.eup %2477 }
 0x6d5   : > { %v2480_v57 = vpop.eup %2479  ;;  %v1724_v58 = vadd.f32 1.0, %v2478_v56  ;;  %v2223_v59 = vpop.f32.mrb[16].mxu1 }
 0x6d6   : > { %v2482_v60 = vpop.eup %2481  ;;  %v1722_v61 = vadd.f32 1.0, %v2480_v57  ;;  %v1692_v62 = vadd.f32 %v2223_v59, %v2072_v43  ;;  %v1683_v63 = vpop.f32.mrb[17].mxu1 }
 0x6d7   : > { %v2484_v0 = vpop.eup %2483  ;;  %v1725_v3 = vadd.f32 1.0, %v2482_v60  ;;  %v1684_v4 = vadd.f32 %v2072_v43, %v1683_v63  ;;  %v2224_v5 = vpop.f32.mrb[18].mxu1  ;;  %v1732_v11 = vmul.f32 %v1724_v58, %v1700_v1 }
 0x6d8   : > { %v1723_v8 = vadd.f32 1.0, %v2484_v0  ;;  %v1712_v9 = vmul.f32 0.70710677, %v1692_v62  ;;  %v1686_v10 = vpop.f32.mrb[19].mxu1  ;;  %v1695_v15 = vadd.f32 %v2224_v5, %v2072_v43  ;;  %v1730_v19 = vmul.f32 %v1722_v61, %v1698_v6 }
 0x6d9   : > { %v1733_v12 = vmul.f32 %v1725_v3, %v1701_v2  ;;  %v1710_v14 = vmul.f32 0.70710677, %v1684_v4  ;;  %v1687_v17 = vadd.f32 %v2072_v43, %v1686_v10  ;;  %v1704_v32 = vmul.f32 0.5, %v1692_v62 }
 0x6da   : > { %v1731_v20 = vmul.f32 %v1723_v8, %v1699_v7  ;;  %2485 = verf.f32 %v1712_v9  ;;  %v1713_v22 = vmul.f32 0.70710677, %v1695_v15  ;;  %v1705_v33 = vmul.f32 0.5, %v1695_v15 }
 0x6db   : > { %v1739_v21 = vpack.c.bf16 %v1733_v12, %v1732_v11  ;;  %2487 = verf.f32 %v1710_v14  ;;  %v1711_v27 = vmul.f32 0.70710677, %v1687_v17  ;;  %v1702_v35 = vmul.f32 0.5, %v1684_v4 }
 0x6dc   : > { %v1738_v23 = vpack.c.bf16 %v1731_v20, %v1730_v19  ;;  %2489 = verf.f32 %v1713_v22  ;;  %v1703_v25 = vmul.f32 0.5, %v1687_v17 }
 0x6dd   : > { %2491 = verf.f32 %v1711_v27 }
 0x6de   : > { %2233 = vmatprep.mubr.msk.bf16.mxu1 %vm1012_vm1, %v1738_v23 }
 0x6df   : > { %2234 = vmatmul.mubr.msk.bf16.vlgmr.msra.gmra.mrb[20].mxu1 %vm1012_vm1, %v1739_v21 }
 0x6e4   : > { %v2486_v28 = vpop.eup %2485 }
 0x6e5   : > { %v2488_v18 = vpop.eup %2487  ;;  %v1728_v29 = vadd.f32 1.0, %v2486_v28 }
 0x6e6   : > { %v2490_v30 = vpop.eup %2489  ;;  %v1726_v16 = vadd.f32 1.0, %v2488_v18 }
 0x6e7   : > { %v2492_v31 = vpop.eup %2491  ;;  %v1729_v34 = vadd.f32 1.0, %v2490_v30  ;;  %v1736_v26 = vmul.f32 %v1728_v29, %v1704_v32 }
 0x6e8   : > { %v1727_v24 = vadd.f32 1.0, %v2492_v31  ;;  %v1734_v37 = vmul.f32 %v1726_v16, %v1702_v35 }
 0x6e9   : > { %v1737_v36 = vmul.f32 %v1729_v34, %v1705_v33 }
 0x6ea   : > { %v1735_v38 = vmul.f32 %v1727_v24, %v1703_v25 }
 0x6eb   : > { %v1741_v13 = vpack.c.bf16 %v1737_v36, %v1736_v26 }
 0x6ec   : > { %v1740_v39 = vpack.c.bf16 %v1735_v38, %v1734_v37 }
 0x6ee   : > { %2237 = vmatprep.mubr.msk.bf16.mxu1 %vm1012_vm1, %v1740_v39 }
 0x6ef   : > { %2238 = vmatmul.mubr.msk.bf16.gmra.mrb[24].mxu1 %vm1012_vm1, %v1741_v13 }
 0x7b2   : > { %v2235_v41 = vpop.f32.mrb[20].mxu1 }
 0x7b3   : > { %v1836_v42 = vadd.f32 %v2235_v41, %v2081_v40  ;;  %v1827_v43 = vpop.f32.mrb[21].mxu1 }
 0x7b4   : > { %v1828_v44 = vadd.f32 %v2081_v40, %v1827_v43  ;;  %v2236_v45 = vpop.f32.mrb[22].mxu1 }
 0x7b5   : > { %1860 = vst.msk [vmem:[%s573_s29 + $0x10] sm:$0xff] %vm1012_vm1, %v1836_v42  ;;  %v1839_v46 = vadd.f32 %v2236_v45, %v2081_v40  ;;  %v1830_v47 = vpop.f32.mrb[23].mxu1 }
 0x7b6   : > { %1858 = vst.msk [vmem:[%s573_s29] sm:$0xff] %vm1012_vm1, %v1828_v44  ;;  %v1831_v48 = vadd.f32 %v2081_v40, %v1830_v47 }
 0x7b7   : > { %1861 = vst.msk [vmem:[%s573_s29 + $0x18] sm:$0xff] %vm1012_vm1, %v1839_v46 }
 0x7b8   : > { %1859 = vst.msk [vmem:[%s573_s29 + $0x8] sm:$0xff] %vm1012_vm1, %v1831_v48 }
 0x7c2   : > { %v2239_v49 = vpop.f32.mrb[24].mxu1 }
 0x7c3   : > { %v1852_v50 = vadd.f32 %v2239_v49, %v2081_v40  ;;  %v1843_v51 = vpop.f32.mrb[25].mxu1 }
 0x7c4   : > { %v1844_v52 = vadd.f32 %v2081_v40, %v1843_v51  ;;  %v2240_v53 = vpop.f32.mrb[26].mxu1 }
 0x7c5   : > { %1864 = vst.msk [vmem:[%s573_s29 + $0x30] sm:$0xff] %vm1012_vm1, %v1852_v50  ;;  %v1855_v54 = vadd.f32 %v2240_v53, %v2081_v40  ;;  %v1846_v55 = vpop.f32.mrb[27].mxu1 }
 0x7c6   : > { %1862 = vst.msk [vmem:[%s573_s29 + $0x20] sm:$0xff] %vm1012_vm1, %v1844_v52  ;;  %v1847_v56 = vadd.f32 %v2081_v40, %v1846_v55 }
 0x7c7   : > { %1865 = vst.msk [vmem:[%s573_s29 + $0x38] sm:$0xff] %vm1012_vm1, %v1855_v54 }
 0x7c8   : > { %1863 = vst.msk [vmem:[%s573_s29 + $0x28] sm:$0xff] %vm1012_vm1, %v1847_v56 }
 0x7c9   : > { %2620 = shalt.err (!%p2617_p9)
}
 0x7ca   : > { %s2621_s5 = scalar_lea.hbm %s3326_s15, 1024  ;;  %s2625_s24 = scalar_lea.hbm %s3427_s12, 2048 }
 0x7cb   : > { %p2622_p0 = scmp.ne.s32.totalorder %s3326_s15, %s2621_s5  ;;  %p2626_p13 = scmp.lt.u32.totalorder %s3326_s15, %s3427_s12 }
 0x7cc   : > { %p2627_p6 = scmp.lt.u32.totalorder %s2625_s24, %s2621_s5  ;;  %p2629_p3 = scmp.lt.u32.totalorder %s2621_s5, %s3326_s15 }
 0x7cd   : > { %p2623_p8 = pnand %p2622_p0, %p2926_p5 }
 0x7ce   : > { %p2628_p10 = por %p2627_p6, %p2626_p13 }
 0x7cf   : > { %p2624_p11 = pneg %p2623_p8 }
 0x7d0   : > { %p2630_p7 = por %p2629_p3, %p2628_p10 }
 0x7d2   : > { %p2631_p12 = pnand %p2630_p7, %p2624_p11 }
 0x7d4   : > { %2634 = shalt.err (!%p2631_p12)
}
 0x7d5   : > { %s2699_s23 = smov 128   ;;  %s2700_s16 = smov 8  }
 0x7d6   : > { %2285 = dma.vmem_to_hbm [thread:$0]  (%p2926_p5), %s3328_s26, 1024, %s3326_s15, %s1867_s22, %s2699_s23, %s2699_s23, %s2700_s16  }
 0x7d7 PF: > { %s3428_s7 = sld [smem:[#allocation15_spill]]  ;;  %s3429_s30 = sld [smem:[#allocation16_spill]] }
 0x7d8   : > { %p3431_p1 = scmp.ge.s32.totalorder %s2681_s21, 2 }
 0x7dd   : > { %s1895_s18 = sand.u32 1, %s3428_s7   ;;  %p3430_p2 = scmp.ne.s32.totalorder %s3429_s30, 0 }
 0x7de   : > { %s1896_s5 = scalar_lea.sflag [#allocation4], %s1895_s18 }
 0x7df   : > { %p2302_p4 = pnand %p3431_p1, %p3430_p2 }
 0x7e1   : > { %2664 = dma.done.wait (!%p2302_p4), %s1896_s5, 1024  }
 0x7e2   : > { %2666 = vsyncadd (!%p2302_p4), %s1896_s5, 4294966272  ;;  %p30_p9 = scmp.ge.s32.totalorder %s2912_s1, 4   ;;  %s3432_s18 = smov %s2673_s19 }
 0x7e3   : > { %s3433_s19 = smov %s2677_s20  ;;  %s3434_s20 = smov %s2922_s11 }
 0x7e4   : > { %s3435_s21 = smov %s2912_s1  ;;  %32 = sbr.rel (!%p30_p9) target bundleno = 15 (0xf), region = 140 }
 0x7eb   :  { %1901 = vsyncpa [#allocation3], 1 }
 0x7ec   :  { %1903 = vsyncpa [#allocation3 + $0x1], 1 }
 0x7ed   :  { %1904 = vsyncpa [#allocation6], 1 }
 0x7ee   :  { %1905 = vsyncpa [#allocation9], 1 }
 0x7ef   :  { %1906 = vsyncpa [#allocation4], 1 }
 0x7f0   :  { %1908 = vsyncpa [#allocation4 + $0x1], 1 }

</bundles_post_ra>
